<compile_context>
chip_gen: v5e
topology: v5e:2x2
jax: 0.10.0
libtpu: 0.0.40
codegen_flags: <defaults>
</compile_context>

<pallas_src>
import jax
import jax.numpy as jnp
from jax.experimental import pallas as pl
from jax.experimental.pallas import tpu as pltpu


def _ffu_kernel(w_ref, b_ref, dfm_ref, x_ref, o_ref, pmax_ref, pmean_ref):
    # w_ref: (98,) SMEM  -> taps [max-channel (49) | mean-channel (49)], row-major (dy, dx)
    # b_ref: (1,)  SMEM
    # dfm_ref, x_ref, o_ref: (bb, C, H, W) VMEM blocks (bb images per grid step)
    # pmax_ref, pmean_ref:   (H+6, W+6)    VMEM scratch (zero-padded SA maps)
    bb, C, H, W = dfm_ref.shape

    # ---- zero only the 3-wide border strips (interior is rewritten per image) ----
    zrow = jnp.zeros((3, W + 6), jnp.float32)
    zcol = jnp.zeros((H, 3), jnp.float32)
    for pref in (pmax_ref, pmean_ref):
        pref[0:3, :] = zrow
        pref[H + 3:H + 6, :] = zrow
        pref[3:3 + H, 0:3] = zcol
        pref[3:3 + H, W + 3:W + 6] = zcol

    bias = b_ref[0]

    for b in range(bb):                          # static unroll; bb is tiny
        dfm_b = dfm_ref[b]                       # (C, H, W)
        x_b = x_ref[b]
        diff = dfm_b - x_b                       # one fused elementwise pass

        # ---- channel-wise max / mean (C static & tiny -> short combine) ----
        m_max = diff[0]
        m_sum = diff[0]
        for c in range(1, C):
            m_max = jnp.maximum(m_max, diff[c])
            m_sum = m_sum + diff[c]
        m_mean = m_sum * (1.0 / C)

        # ---- write interiors of the padded maps (pad=3 each side) ----
        pmax_ref[3:3 + H, 3:3 + W] = m_max
        pmean_ref[3:3 + H, 3:3 + W] = m_mean

        # ---- 7x7 conv: 1 row-slab load per dy, lane-slice dx shifts,
        #      14 independent partial accumulators, tree-summed ----
        parts = []
        for dy in range(7):
            rmax = pmax_ref[dy:dy + H, :]        # (H, W+6) loaded once per dy
            rmean = pmean_ref[dy:dy + H, :]
            pmx = w_ref[dy * 7] * rmax[:, 0:W]
            pmn = w_ref[49 + dy * 7] * rmean[:, 0:W]
            for dx in range(1, 7):
                pmx = pmx + w_ref[dy * 7 + dx] * rmax[:, dx:dx + W]
                pmn = pmn + w_ref[49 + dy * 7 + dx] * rmean[:, dx:dx + W]
            parts.append(pmx)
            parts.append(pmn)
        while len(parts) > 1:                    # tree reduce the partials
            nxt = [parts[i] + parts[i + 1] for i in range(0, len(parts) - 1, 2)]
            if len(parts) % 2:
                nxt.append(parts[-1])
            parts = nxt
        acc = parts[0] + bias                    # (H, W)

        wei = jax.nn.sigmoid(acc)                # exp + recip on the EUP slot

        # ---- out = x + dfm * wei  (single vectorized (C,H,W) store) ----
        o_ref[b] = x_b + dfm_b * wei[None, :, :]


def ffu(dfm, x, w_sa, b_sa):
    """FFU forward.  dfm, x: (B, C, H, W) f32; w_sa: (1, 2, 7, 7); b_sa: (1,)."""
    B, C, H, W = dfm.shape
    w_flat = w_sa.astype(jnp.float32).reshape(-1)   # (98,)  [max-ch taps | mean-ch taps]
    b_flat = b_sa.astype(jnp.float32).reshape(-1)   # (1,)

    # Batch folding with a preserved parallel axis: at most 2 grid steps so both
    # v7x TensorCores get work when B >= 2, while larger B is folded into the
    # block to amortize the fixed 98-tap instruction stream and step overhead.
    n_steps = 2 if B >= 2 else 1
    bb = pl.cdiv(B, n_steps)
    n_steps = pl.cdiv(B, bb)

    return pl.pallas_call(
        _ffu_kernel,
        out_shape=jax.ShapeDtypeStruct((B, C, H, W), jnp.float32),
        grid=(n_steps,),
        in_specs=[
            pl.BlockSpec(memory_space=pltpu.MemorySpace.SMEM),        # conv taps (98,)
            pl.BlockSpec(memory_space=pltpu.MemorySpace.SMEM),        # conv bias (1,)
            pl.BlockSpec((bb, C, H, W), lambda i: (i, 0, 0, 0)),      # dfm
            pl.BlockSpec((bb, C, H, W), lambda i: (i, 0, 0, 0)),      # x
        ],
        out_specs=pl.BlockSpec((bb, C, H, W), lambda i: (i, 0, 0, 0)),
        scratch_shapes=[pltpu.VMEM((H + 6, W + 6), jnp.float32),
                        pltpu.VMEM((H + 6, W + 6), jnp.float32)],
        compiler_params=pltpu.CompilerParams(
            dimension_semantics=("parallel",)),
    )(w_flat, b_flat, dfm.astype(jnp.float32), x.astype(jnp.float32))


# ----------------------------- pure-JAX reference -----------------------------

def ffu_ref(dfm, x, w_sa, b_sa):
    diff = dfm - x
    maca = jnp.max(diff, axis=1, keepdims=True)
    avca = jnp.mean(diff, axis=1, keepdims=True)
    com = jnp.concatenate([maca, avca], axis=1)                      # (B, 2, H, W)
    sa = jax.lax.conv_general_dilated(
        com, w_sa, window_strides=(1, 1), padding=((3, 3), (3, 3)),
        dimension_numbers=("NCHW", "OIHW", "NCHW"))
    sa = sa + b_sa.reshape(1, 1, 1, 1)
    wei = jax.nn.sigmoid(sa)
    return x + dfm * wei


if __name__ == "__main__":
    B, C, H, W = 2, 4, 16, 16

    key = jax.random.PRNGKey(0)
    k1, k2, k3, k4 = jax.random.split(key, 4)
    dfm = jax.random.normal(k1, (B, C, H, W), jnp.float32)
    x = jax.random.normal(k2, (B, C, H, W), jnp.float32)
    w_sa = 0.1 * jax.random.normal(k3, (1, 2, 7, 7), jnp.float32)
    b_sa = 0.1 * jax.random.normal(k4, (1,), jnp.float32)

    fwd = jax.jit(ffu)
    out = fwd(dfm, x, w_sa, b_sa)
    jax.block_until_ready(out)
    assert out.shape == (B, C, H, W)

    ref = ffu_ref(dfm, x, w_sa, b_sa)
    assert jnp.allclose(out, ref, atol=2e-4, rtol=2e-4), (
        float(jnp.max(jnp.abs(out - ref))))

    print("KERNEL_OK")
</pallas_src>

<mosaic_0001>
module attributes {stable_mosaic.version = 11 : i64} {
  func.func @_ffu_kernel(%arg0: i32, %arg1: memref<98xf32, #tpu.memory_space<smem>>, %arg2: memref<1xf32, #tpu.memory_space<smem>>, %arg3: memref<1x4x16x16xf32, #tpu.memory_space<vmem>>, %arg4: memref<1x4x16x16xf32, #tpu.memory_space<vmem>>, %arg5: memref<1x4x16x16xf32, #tpu.memory_space<vmem>>, %arg6: memref<22x22xf32, #tpu.memory_space<vmem>>, %arg7: memref<22x22xf32, #tpu.memory_space<vmem>>) attributes {dimension_semantics = [#tpu.dimension_semantics<parallel>], iteration_bounds = array<i64: 2>, scalar_prefetch = 0 : i64, scratch_operands = 2 : i64, tpu.core_type = #tpu.core_type<tc>, window_params = [{transform_indices = @transform_0, window_bounds = array<i64: 98>}, {transform_indices = @transform_1, window_bounds = array<i64: 1>}, {transform_indices = @transform_2, window_bounds = array<i64: 1, 4, 16, 16>}, {transform_indices = @transform_3, window_bounds = array<i64: 1, 4, 16, 16>}, {transform_indices = @transform_4, window_bounds = array<i64: 1, 4, 16, 16>}]} {
    %cst = arith.constant 0.000000e+00 : f32
    %0 = vector.broadcast %cst : f32 to vector<3x22xf32>
    %cst_0 = arith.constant 0.000000e+00 : f32
    %1 = vector.broadcast %cst_0 : f32 to vector<16x3xf32>
    %c0 = arith.constant 0 : index
    %c0_1 = arith.constant 0 : index
    %2 = vector.load %arg6[%c0, %c0_1] : memref<22x22xf32, #tpu.memory_space<vmem>>, vector<3x22xf32>
    tpu.vector_store %arg6[%c0, %c0_1], %0 {strides = array<i32>} : memref<22x22xf32, #tpu.memory_space<vmem>>, vector<3x22xf32>,
    %c19 = arith.constant 19 : index
    %c0_2 = arith.constant 0 : index
    %3 = vector.load %arg6[%c19, %c0_2] : memref<22x22xf32, #tpu.memory_space<vmem>>, vector<3x22xf32>
    tpu.vector_store %arg6[%c19, %c0_2], %0 {strides = array<i32>} : memref<22x22xf32, #tpu.memory_space<vmem>>, vector<3x22xf32>,
    %c3 = arith.constant 3 : index
    %c0_3 = arith.constant 0 : index
    %4 = vector.load %arg6[%c3, %c0_3] : memref<22x22xf32, #tpu.memory_space<vmem>>, vector<16x3xf32>
    tpu.vector_store %arg6[%c3, %c0_3], %1 {strides = array<i32>} : memref<22x22xf32, #tpu.memory_space<vmem>>, vector<16x3xf32>,
    %c3_4 = arith.constant 3 : index
    %c19_5 = arith.constant 19 : index
    %5 = vector.load %arg6[%c3_4, %c19_5] : memref<22x22xf32, #tpu.memory_space<vmem>>, vector<16x3xf32>
    tpu.vector_store %arg6[%c3_4, %c19_5], %1 {strides = array<i32>} : memref<22x22xf32, #tpu.memory_space<vmem>>, vector<16x3xf32>,
    %c0_6 = arith.constant 0 : index
    %c0_7 = arith.constant 0 : index
    %6 = vector.load %arg7[%c0_6, %c0_7] : memref<22x22xf32, #tpu.memory_space<vmem>>, vector<3x22xf32>
    tpu.vector_store %arg7[%c0_6, %c0_7], %0 {strides = array<i32>} : memref<22x22xf32, #tpu.memory_space<vmem>>, vector<3x22xf32>,
    %c19_8 = arith.constant 19 : index
    %c0_9 = arith.constant 0 : index
    %7 = vector.load %arg7[%c19_8, %c0_9] : memref<22x22xf32, #tpu.memory_space<vmem>>, vector<3x22xf32>
    tpu.vector_store %arg7[%c19_8, %c0_9], %0 {strides = array<i32>} : memref<22x22xf32, #tpu.memory_space<vmem>>, vector<3x22xf32>,
    %c3_10 = arith.constant 3 : index
    %c0_11 = arith.constant 0 : index
    %8 = vector.load %arg7[%c3_10, %c0_11] : memref<22x22xf32, #tpu.memory_space<vmem>>, vector<16x3xf32>
    tpu.vector_store %arg7[%c3_10, %c0_11], %1 {strides = array<i32>} : memref<22x22xf32, #tpu.memory_space<vmem>>, vector<16x3xf32>,
    %c3_12 = arith.constant 3 : index
    %c19_13 = arith.constant 19 : index
    %9 = vector.load %arg7[%c3_12, %c19_13] : memref<22x22xf32, #tpu.memory_space<vmem>>, vector<16x3xf32>
    tpu.vector_store %arg7[%c3_12, %c19_13], %1 {strides = array<i32>} : memref<22x22xf32, #tpu.memory_space<vmem>>, vector<16x3xf32>,
    %c0_14 = arith.constant 0 : index
    %10 = memref.load %arg2[%c0_14] : memref<1xf32, #tpu.memory_space<smem>>
    %c0_15 = arith.constant 0 : index
    %c0_16 = arith.constant 0 : index
    %c0_17 = arith.constant 0 : index
    %c0_18 = arith.constant 0 : index
    %11 = vector.load %arg3[%c0_15, %c0_16, %c0_17, %c0_18] : memref<1x4x16x16xf32, #tpu.memory_space<vmem>>, vector<1x4x16x16xf32>
    %12 = vector.shape_cast %11 : vector<1x4x16x16xf32> to vector<4x16x16xf32>
    %c0_19 = arith.constant 0 : index
    %c0_20 = arith.constant 0 : index
    %c0_21 = arith.constant 0 : index
    %c0_22 = arith.constant 0 : index
    %13 = vector.load %arg4[%c0_19, %c0_20, %c0_21, %c0_22] : memref<1x4x16x16xf32, #tpu.memory_space<vmem>>, vector<1x4x16x16xf32>
    %14 = vector.shape_cast %13 : vector<1x4x16x16xf32> to vector<4x16x16xf32>
    %15 = arith.subf %12, %14 : vector<4x16x16xf32>
    %16 = vector.extract_strided_slice %15 {offsets = [0, 0, 0], sizes = [1, 16, 16], strides = [1, 1, 1]} : vector<4x16x16xf32> to vector<1x16x16xf32>
    %17 = vector.shape_cast %16 : vector<1x16x16xf32> to vector<16x16xf32>
    %18 = vector.extract_strided_slice %15 {offsets = [0, 0, 0], sizes = [1, 16, 16], strides = [1, 1, 1]} : vector<4x16x16xf32> to vector<1x16x16xf32>
    %19 = vector.shape_cast %18 : vector<1x16x16xf32> to vector<16x16xf32>
    %20 = vector.extract_strided_slice %15 {offsets = [1, 0, 0], sizes = [1, 16, 16], strides = [1, 1, 1]} : vector<4x16x16xf32> to vector<1x16x16xf32>
    %21 = vector.shape_cast %20 : vector<1x16x16xf32> to vector<16x16xf32>
    %22 = arith.maximumf %17, %21 : vector<16x16xf32>
    %23 = vector.extract_strided_slice %15 {offsets = [1, 0, 0], sizes = [1, 16, 16], strides = [1, 1, 1]} : vector<4x16x16xf32> to vector<1x16x16xf32>
    %24 = vector.shape_cast %23 : vector<1x16x16xf32> to vector<16x16xf32>
    %25 = arith.addf %19, %24 : vector<16x16xf32>
    %26 = vector.extract_strided_slice %15 {offsets = [2, 0, 0], sizes = [1, 16, 16], strides = [1, 1, 1]} : vector<4x16x16xf32> to vector<1x16x16xf32>
    %27 = vector.shape_cast %26 : vector<1x16x16xf32> to vector<16x16xf32>
    %28 = arith.maximumf %22, %27 : vector<16x16xf32>
    %29 = vector.extract_strided_slice %15 {offsets = [2, 0, 0], sizes = [1, 16, 16], strides = [1, 1, 1]} : vector<4x16x16xf32> to vector<1x16x16xf32>
    %30 = vector.shape_cast %29 : vector<1x16x16xf32> to vector<16x16xf32>
    %31 = arith.addf %25, %30 : vector<16x16xf32>
    %32 = vector.extract_strided_slice %15 {offsets = [3, 0, 0], sizes = [1, 16, 16], strides = [1, 1, 1]} : vector<4x16x16xf32> to vector<1x16x16xf32>
    %33 = vector.shape_cast %32 : vector<1x16x16xf32> to vector<16x16xf32>
    %34 = arith.maximumf %28, %33 : vector<16x16xf32>
    %35 = vector.extract_strided_slice %15 {offsets = [3, 0, 0], sizes = [1, 16, 16], strides = [1, 1, 1]} : vector<4x16x16xf32> to vector<1x16x16xf32>
    %36 = vector.shape_cast %35 : vector<1x16x16xf32> to vector<16x16xf32>
    %37 = arith.addf %31, %36 : vector<16x16xf32>
    %cst_23 = arith.constant 2.500000e-01 : f32
    %38 = vector.broadcast %cst_23 : f32 to vector<16x16xf32>
    %39 = arith.mulf %37, %38 : vector<16x16xf32>
    %c3_24 = arith.constant 3 : index
    %c3_25 = arith.constant 3 : index
    %40 = vector.load %arg6[%c3_24, %c3_25] : memref<22x22xf32, #tpu.memory_space<vmem>>, vector<16x16xf32>
    tpu.vector_store %arg6[%c3_24, %c3_25], %34 {strides = array<i32>} : memref<22x22xf32, #tpu.memory_space<vmem>>, vector<16x16xf32>,
    %c3_26 = arith.constant 3 : index
    %c3_27 = arith.constant 3 : index
    %41 = vector.load %arg7[%c3_26, %c3_27] : memref<22x22xf32, #tpu.memory_space<vmem>>, vector<16x16xf32>
    tpu.vector_store %arg7[%c3_26, %c3_27], %39 {strides = array<i32>} : memref<22x22xf32, #tpu.memory_space<vmem>>, vector<16x16xf32>,
    %c0_28 = arith.constant 0 : index
    %c0_29 = arith.constant 0 : index
    %42 = vector.load %arg6[%c0_28, %c0_29] : memref<22x22xf32, #tpu.memory_space<vmem>>, vector<16x22xf32>
    %c0_30 = arith.constant 0 : index
    %c0_31 = arith.constant 0 : index
    %43 = vector.load %arg7[%c0_30, %c0_31] : memref<22x22xf32, #tpu.memory_space<vmem>>, vector<16x22xf32>
    %c0_32 = arith.constant 0 : index
    %44 = memref.load %arg1[%c0_32] : memref<98xf32, #tpu.memory_space<smem>>
    %45 = vector.extract_strided_slice %42 {offsets = [0, 0], sizes = [16, 16], strides = [1, 1]} : vector<16x22xf32> to vector<16x16xf32>
    %46 = vector.broadcast %44 : f32 to vector<16x16xf32>
    %47 = arith.mulf %46, %45 : vector<16x16xf32>
    %c49 = arith.constant 49 : index
    %48 = memref.load %arg1[%c49] : memref<98xf32, #tpu.memory_space<smem>>
    %49 = vector.extract_strided_slice %43 {offsets = [0, 0], sizes = [16, 16], strides = [1, 1]} : vector<16x22xf32> to vector<16x16xf32>
    %50 = vector.broadcast %48 : f32 to vector<16x16xf32>
    %51 = arith.mulf %50, %49 : vector<16x16xf32>
    %c1 = arith.constant 1 : index
    %52 = memref.load %arg1[%c1] : memref<98xf32, #tpu.memory_space<smem>>
    %53 = vector.extract_strided_slice %42 {offsets = [0, 1], sizes = [16, 16], strides = [1, 1]} : vector<16x22xf32> to vector<16x16xf32>
    %54 = vector.broadcast %52 : f32 to vector<16x16xf32>
    %55 = arith.mulf %54, %53 : vector<16x16xf32>
    %56 = arith.addf %47, %55 : vector<16x16xf32>
    %c50 = arith.constant 50 : index
    %57 = memref.load %arg1[%c50] : memref<98xf32, #tpu.memory_space<smem>>
    %58 = vector.extract_strided_slice %43 {offsets = [0, 1], sizes = [16, 16], strides = [1, 1]} : vector<16x22xf32> to vector<16x16xf32>
    %59 = vector.broadcast %57 : f32 to vector<16x16xf32>
    %60 = arith.mulf %59, %58 : vector<16x16xf32>
    %61 = arith.addf %51, %60 : vector<16x16xf32>
    %c2 = arith.constant 2 : index
    %62 = memref.load %arg1[%c2] : memref<98xf32, #tpu.memory_space<smem>>
    %63 = vector.extract_strided_slice %42 {offsets = [0, 2], sizes = [16, 16], strides = [1, 1]} : vector<16x22xf32> to vector<16x16xf32>
    %64 = vector.broadcast %62 : f32 to vector<16x16xf32>
    %65 = arith.mulf %64, %63 : vector<16x16xf32>
    %66 = arith.addf %56, %65 : vector<16x16xf32>
    %c51 = arith.constant 51 : index
    %67 = memref.load %arg1[%c51] : memref<98xf32, #tpu.memory_space<smem>>
    %68 = vector.extract_strided_slice %43 {offsets = [0, 2], sizes = [16, 16], strides = [1, 1]} : vector<16x22xf32> to vector<16x16xf32>
    %69 = vector.broadcast %67 : f32 to vector<16x16xf32>
    %70 = arith.mulf %69, %68 : vector<16x16xf32>
    %71 = arith.addf %61, %70 : vector<16x16xf32>
    %c3_33 = arith.constant 3 : index
    %72 = memref.load %arg1[%c3_33] : memref<98xf32, #tpu.memory_space<smem>>
    %73 = vector.extract_strided_slice %42 {offsets = [0, 3], sizes = [16, 16], strides = [1, 1]} : vector<16x22xf32> to vector<16x16xf32>
    %74 = vector.broadcast %72 : f32 to vector<16x16xf32>
    %75 = arith.mulf %74, %73 : vector<16x16xf32>
    %76 = arith.addf %66, %75 : vector<16x16xf32>
    %c52 = arith.constant 52 : index
    %77 = memref.load %arg1[%c52] : memref<98xf32, #tpu.memory_space<smem>>
    %78 = vector.extract_strided_slice %43 {offsets = [0, 3], sizes = [16, 16], strides = [1, 1]} : vector<16x22xf32> to vector<16x16xf32>
    %79 = vector.broadcast %77 : f32 to vector<16x16xf32>
    %80 = arith.mulf %79, %78 : vector<16x16xf32>
    %81 = arith.addf %71, %80 : vector<16x16xf32>
    %c4 = arith.constant 4 : index
    %82 = memref.load %arg1[%c4] : memref<98xf32, #tpu.memory_space<smem>>
    %83 = vector.extract_strided_slice %42 {offsets = [0, 4], sizes = [16, 16], strides = [1, 1]} : vector<16x22xf32> to vector<16x16xf32>
    %84 = vector.broadcast %82 : f32 to vector<16x16xf32>
    %85 = arith.mulf %84, %83 : vector<16x16xf32>
    %86 = arith.addf %76, %85 : vector<16x16xf32>
    %c53 = arith.constant 53 : index
    %87 = memref.load %arg1[%c53] : memref<98xf32, #tpu.memory_space<smem>>
    %88 = vector.extract_strided_slice %43 {offsets = [0, 4], sizes = [16, 16], strides = [1, 1]} : vector<16x22xf32> to vector<16x16xf32>
    %89 = vector.broadcast %87 : f32 to vector<16x16xf32>
    %90 = arith.mulf %89, %88 : vector<16x16xf32>
    %91 = arith.addf %81, %90 : vector<16x16xf32>
    %c5 = arith.constant 5 : index
    %92 = memref.load %arg1[%c5] : memref<98xf32, #tpu.memory_space<smem>>
    %93 = vector.extract_strided_slice %42 {offsets = [0, 5], sizes = [16, 16], strides = [1, 1]} : vector<16x22xf32> to vector<16x16xf32>
    %94 = vector.broadcast %92 : f32 to vector<16x16xf32>
    %95 = arith.mulf %94, %93 : vector<16x16xf32>
    %96 = arith.addf %86, %95 : vector<16x16xf32>
    %c54 = arith.constant 54 : index
    %97 = memref.load %arg1[%c54] : memref<98xf32, #tpu.memory_space<smem>>
    %98 = vector.extract_strided_slice %43 {offsets = [0, 5], sizes = [16, 16], strides = [1, 1]} : vector<16x22xf32> to vector<16x16xf32>
    %99 = vector.broadcast %97 : f32 to vector<16x16xf32>
    %100 = arith.mulf %99, %98 : vector<16x16xf32>
    %101 = arith.addf %91, %100 : vector<16x16xf32>
    %c6 = arith.constant 6 : index
    %102 = memref.load %arg1[%c6] : memref<98xf32, #tpu.memory_space<smem>>
    %103 = vector.extract_strided_slice %42 {offsets = [0, 6], sizes = [16, 16], strides = [1, 1]} : vector<16x22xf32> to vector<16x16xf32>
    %104 = vector.broadcast %102 : f32 to vector<16x16xf32>
    %105 = arith.mulf %104, %103 : vector<16x16xf32>
    %106 = arith.addf %96, %105 : vector<16x16xf32>
    %c55 = arith.constant 55 : index
    %107 = memref.load %arg1[%c55] : memref<98xf32, #tpu.memory_space<smem>>
    %108 = vector.extract_strided_slice %43 {offsets = [0, 6], sizes = [16, 16], strides = [1, 1]} : vector<16x22xf32> to vector<16x16xf32>
    %109 = vector.broadcast %107 : f32 to vector<16x16xf32>
    %110 = arith.mulf %109, %108 : vector<16x16xf32>
    %111 = arith.addf %101, %110 : vector<16x16xf32>
    %c1_34 = arith.constant 1 : index
    %c0_35 = arith.constant 0 : index
    %112 = vector.load %arg6[%c1_34, %c0_35] : memref<22x22xf32, #tpu.memory_space<vmem>>, vector<16x22xf32>
    %c1_36 = arith.constant 1 : index
    %c0_37 = arith.constant 0 : index
    %113 = vector.load %arg7[%c1_36, %c0_37] : memref<22x22xf32, #tpu.memory_space<vmem>>, vector<16x22xf32>
    %c7 = arith.constant 7 : index
    %114 = memref.load %arg1[%c7] : memref<98xf32, #tpu.memory_space<smem>>
    %115 = vector.extract_strided_slice %112 {offsets = [0, 0], sizes = [16, 16], strides = [1, 1]} : vector<16x22xf32> to vector<16x16xf32>
    %116 = vector.broadcast %114 : f32 to vector<16x16xf32>
    %117 = arith.mulf %116, %115 : vector<16x16xf32>
    %c56 = arith.constant 56 : index
    %118 = memref.load %arg1[%c56] : memref<98xf32, #tpu.memory_space<smem>>
    %119 = vector.extract_strided_slice %113 {offsets = [0, 0], sizes = [16, 16], strides = [1, 1]} : vector<16x22xf32> to vector<16x16xf32>
    %120 = vector.broadcast %118 : f32 to vector<16x16xf32>
    %121 = arith.mulf %120, %119 : vector<16x16xf32>
    %c8 = arith.constant 8 : index
    %122 = memref.load %arg1[%c8] : memref<98xf32, #tpu.memory_space<smem>>
    %123 = vector.extract_strided_slice %112 {offsets = [0, 1], sizes = [16, 16], strides = [1, 1]} : vector<16x22xf32> to vector<16x16xf32>
    %124 = vector.broadcast %122 : f32 to vector<16x16xf32>
    %125 = arith.mulf %124, %123 : vector<16x16xf32>
    %126 = arith.addf %117, %125 : vector<16x16xf32>
    %c57 = arith.constant 57 : index
    %127 = memref.load %arg1[%c57] : memref<98xf32, #tpu.memory_space<smem>>
    %128 = vector.extract_strided_slice %113 {offsets = [0, 1], sizes = [16, 16], strides = [1, 1]} : vector<16x22xf32> to vector<16x16xf32>
    %129 = vector.broadcast %127 : f32 to vector<16x16xf32>
    %130 = arith.mulf %129, %128 : vector<16x16xf32>
    %131 = arith.addf %121, %130 : vector<16x16xf32>
    %c9 = arith.constant 9 : index
    %132 = memref.load %arg1[%c9] : memref<98xf32, #tpu.memory_space<smem>>
    %133 = vector.extract_strided_slice %112 {offsets = [0, 2], sizes = [16, 16], strides = [1, 1]} : vector<16x22xf32> to vector<16x16xf32>
    %134 = vector.broadcast %132 : f32 to vector<16x16xf32>
    %135 = arith.mulf %134, %133 : vector<16x16xf32>
    %136 = arith.addf %126, %135 : vector<16x16xf32>
    %c58 = arith.constant 58 : index
    %137 = memref.load %arg1[%c58] : memref<98xf32, #tpu.memory_space<smem>>
    %138 = vector.extract_strided_slice %113 {offsets = [0, 2], sizes = [16, 16], strides = [1, 1]} : vector<16x22xf32> to vector<16x16xf32>
    %139 = vector.broadcast %137 : f32 to vector<16x16xf32>
    %140 = arith.mulf %139, %138 : vector<16x16xf32>
    %141 = arith.addf %131, %140 : vector<16x16xf32>
    %c10 = arith.constant 10 : index
    %142 = memref.load %arg1[%c10] : memref<98xf32, #tpu.memory_space<smem>>
    %143 = vector.extract_strided_slice %112 {offsets = [0, 3], sizes = [16, 16], strides = [1, 1]} : vector<16x22xf32> to vector<16x16xf32>
    %144 = vector.broadcast %142 : f32 to vector<16x16xf32>
    %145 = arith.mulf %144, %143 : vector<16x16xf32>
    %146 = arith.addf %136, %145 : vector<16x16xf32>
    %c59 = arith.constant 59 : index
    %147 = memref.load %arg1[%c59] : memref<98xf32, #tpu.memory_space<smem>>
    %148 = vector.extract_strided_slice %113 {offsets = [0, 3], sizes = [16, 16], strides = [1, 1]} : vector<16x22xf32> to vector<16x16xf32>
    %149 = vector.broadcast %147 : f32 to vector<16x16xf32>
    %150 = arith.mulf %149, %148 : vector<16x16xf32>
    %151 = arith.addf %141, %150 : vector<16x16xf32>
    %c11 = arith.constant 11 : index
    %152 = memref.load %arg1[%c11] : memref<98xf32, #tpu.memory_space<smem>>
    %153 = vector.extract_strided_slice %112 {offsets = [0, 4], sizes = [16, 16], strides = [1, 1]} : vector<16x22xf32> to vector<16x16xf32>
    %154 = vector.broadcast %152 : f32 to vector<16x16xf32>
    %155 = arith.mulf %154, %153 : vector<16x16xf32>
    %156 = arith.addf %146, %155 : vector<16x16xf32>
    %c60 = arith.constant 60 : index
    %157 = memref.load %arg1[%c60] : memref<98xf32, #tpu.memory_space<smem>>
    %158 = vector.extract_strided_slice %113 {offsets = [0, 4], sizes = [16, 16], strides = [1, 1]} : vector<16x22xf32> to vector<16x16xf32>
    %159 = vector.broadcast %157 : f32 to vector<16x16xf32>
    %160 = arith.mulf %159, %158 : vector<16x16xf32>
    %161 = arith.addf %151, %160 : vector<16x16xf32>
    %c12 = arith.constant 12 : index
    %162 = memref.load %arg1[%c12] : memref<98xf32, #tpu.memory_space<smem>>
    %163 = vector.extract_strided_slice %112 {offsets = [0, 5], sizes = [16, 16], strides = [1, 1]} : vector<16x22xf32> to vector<16x16xf32>
    %164 = vector.broadcast %162 : f32 to vector<16x16xf32>
    %165 = arith.mulf %164, %163 : vector<16x16xf32>
    %166 = arith.addf %156, %165 : vector<16x16xf32>
    %c61 = arith.constant 61 : index
    %167 = memref.load %arg1[%c61] : memref<98xf32, #tpu.memory_space<smem>>
    %168 = vector.extract_strided_slice %113 {offsets = [0, 5], sizes = [16, 16], strides = [1, 1]} : vector<16x22xf32> to vector<16x16xf32>
    %169 = vector.broadcast %167 : f32 to vector<16x16xf32>
    %170 = arith.mulf %169, %168 : vector<16x16xf32>
    %171 = arith.addf %161, %170 : vector<16x16xf32>
    %c13 = arith.constant 13 : index
    %172 = memref.load %arg1[%c13] : memref<98xf32, #tpu.memory_space<smem>>
    %173 = vector.extract_strided_slice %112 {offsets = [0, 6], sizes = [16, 16], strides = [1, 1]} : vector<16x22xf32> to vector<16x16xf32>
    %174 = vector.broadcast %172 : f32 to vector<16x16xf32>
    %175 = arith.mulf %174, %173 : vector<16x16xf32>
    %176 = arith.addf %166, %175 : vector<16x16xf32>
    %c62 = arith.constant 62 : index
    %177 = memref.load %arg1[%c62] : memref<98xf32, #tpu.memory_space<smem>>
    %178 = vector.extract_strided_slice %113 {offsets = [0, 6], sizes = [16, 16], strides = [1, 1]} : vector<16x22xf32> to vector<16x16xf32>
    %179 = vector.broadcast %177 : f32 to vector<16x16xf32>
    %180 = arith.mulf %179, %178 : vector<16x16xf32>
    %181 = arith.addf %171, %180 : vector<16x16xf32>
    %c2_38 = arith.constant 2 : index
    %c0_39 = arith.constant 0 : index
    %182 = vector.load %arg6[%c2_38, %c0_39] : memref<22x22xf32, #tpu.memory_space<vmem>>, vector<16x22xf32>
    %c2_40 = arith.constant 2 : index
    %c0_41 = arith.constant 0 : index
    %183 = vector.load %arg7[%c2_40, %c0_41] : memref<22x22xf32, #tpu.memory_space<vmem>>, vector<16x22xf32>
    %c14 = arith.constant 14 : index
    %184 = memref.load %arg1[%c14] : memref<98xf32, #tpu.memory_space<smem>>
    %185 = vector.extract_strided_slice %182 {offsets = [0, 0], sizes = [16, 16], strides = [1, 1]} : vector<16x22xf32> to vector<16x16xf32>
    %186 = vector.broadcast %184 : f32 to vector<16x16xf32>
    %187 = arith.mulf %186, %185 : vector<16x16xf32>
    %c63 = arith.constant 63 : index
    %188 = memref.load %arg1[%c63] : memref<98xf32, #tpu.memory_space<smem>>
    %189 = vector.extract_strided_slice %183 {offsets = [0, 0], sizes = [16, 16], strides = [1, 1]} : vector<16x22xf32> to vector<16x16xf32>
    %190 = vector.broadcast %188 : f32 to vector<16x16xf32>
    %191 = arith.mulf %190, %189 : vector<16x16xf32>
    %c15 = arith.constant 15 : index
    %192 = memref.load %arg1[%c15] : memref<98xf32, #tpu.memory_space<smem>>
    %193 = vector.extract_strided_slice %182 {offsets = [0, 1], sizes = [16, 16], strides = [1, 1]} : vector<16x22xf32> to vector<16x16xf32>
    %194 = vector.broadcast %192 : f32 to vector<16x16xf32>
    %195 = arith.mulf %194, %193 : vector<16x16xf32>
    %196 = arith.addf %187, %195 : vector<16x16xf32>
    %c64 = arith.constant 64 : index
    %197 = memref.load %arg1[%c64] : memref<98xf32, #tpu.memory_space<smem>>
    %198 = vector.extract_strided_slice %183 {offsets = [0, 1], sizes = [16, 16], strides = [1, 1]} : vector<16x22xf32> to vector<16x16xf32>
    %199 = vector.broadcast %197 : f32 to vector<16x16xf32>
    %200 = arith.mulf %199, %198 : vector<16x16xf32>
    %201 = arith.addf %191, %200 : vector<16x16xf32>
    %c16 = arith.constant 16 : index
    %202 = memref.load %arg1[%c16] : memref<98xf32, #tpu.memory_space<smem>>
    %203 = vector.extract_strided_slice %182 {offsets = [0, 2], sizes = [16, 16], strides = [1, 1]} : vector<16x22xf32> to vector<16x16xf32>
    %204 = vector.broadcast %202 : f32 to vector<16x16xf32>
    %205 = arith.mulf %204, %203 : vector<16x16xf32>
    %206 = arith.addf %196, %205 : vector<16x16xf32>
    %c65 = arith.constant 65 : index
    %207 = memref.load %arg1[%c65] : memref<98xf32, #tpu.memory_space<smem>>
    %208 = vector.extract_strided_slice %183 {offsets = [0, 2], sizes = [16, 16], strides = [1, 1]} : vector<16x22xf32> to vector<16x16xf32>
    %209 = vector.broadcast %207 : f32 to vector<16x16xf32>
    %210 = arith.mulf %209, %208 : vector<16x16xf32>
    %211 = arith.addf %201, %210 : vector<16x16xf32>
    %c17 = arith.constant 17 : index
    %212 = memref.load %arg1[%c17] : memref<98xf32, #tpu.memory_space<smem>>
    %213 = vector.extract_strided_slice %182 {offsets = [0, 3], sizes = [16, 16], strides = [1, 1]} : vector<16x22xf32> to vector<16x16xf32>
    %214 = vector.broadcast %212 : f32 to vector<16x16xf32>
    %215 = arith.mulf %214, %213 : vector<16x16xf32>
    %216 = arith.addf %206, %215 : vector<16x16xf32>
    %c66 = arith.constant 66 : index
    %217 = memref.load %arg1[%c66] : memref<98xf32, #tpu.memory_space<smem>>
    %218 = vector.extract_strided_slice %183 {offsets = [0, 3], sizes = [16, 16], strides = [1, 1]} : vector<16x22xf32> to vector<16x16xf32>
    %219 = vector.broadcast %217 : f32 to vector<16x16xf32>
    %220 = arith.mulf %219, %218 : vector<16x16xf32>
    %221 = arith.addf %211, %220 : vector<16x16xf32>
    %c18 = arith.constant 18 : index
    %222 = memref.load %arg1[%c18] : memref<98xf32, #tpu.memory_space<smem>>
    %223 = vector.extract_strided_slice %182 {offsets = [0, 4], sizes = [16, 16], strides = [1, 1]} : vector<16x22xf32> to vector<16x16xf32>
    %224 = vector.broadcast %222 : f32 to vector<16x16xf32>
    %225 = arith.mulf %224, %223 : vector<16x16xf32>
    %226 = arith.addf %216, %225 : vector<16x16xf32>
    %c67 = arith.constant 67 : index
    %227 = memref.load %arg1[%c67] : memref<98xf32, #tpu.memory_space<smem>>
    %228 = vector.extract_strided_slice %183 {offsets = [0, 4], sizes = [16, 16], strides = [1, 1]} : vector<16x22xf32> to vector<16x16xf32>
    %229 = vector.broadcast %227 : f32 to vector<16x16xf32>
    %230 = arith.mulf %229, %228 : vector<16x16xf32>
    %231 = arith.addf %221, %230 : vector<16x16xf32>
    %c19_42 = arith.constant 19 : index
    %232 = memref.load %arg1[%c19_42] : memref<98xf32, #tpu.memory_space<smem>>
    %233 = vector.extract_strided_slice %182 {offsets = [0, 5], sizes = [16, 16], strides = [1, 1]} : vector<16x22xf32> to vector<16x16xf32>
    %234 = vector.broadcast %232 : f32 to vector<16x16xf32>
    %235 = arith.mulf %234, %233 : vector<16x16xf32>
    %236 = arith.addf %226, %235 : vector<16x16xf32>
    %c68 = arith.constant 68 : index
    %237 = memref.load %arg1[%c68] : memref<98xf32, #tpu.memory_space<smem>>
    %238 = vector.extract_strided_slice %183 {offsets = [0, 5], sizes = [16, 16], strides = [1, 1]} : vector<16x22xf32> to vector<16x16xf32>
    %239 = vector.broadcast %237 : f32 to vector<16x16xf32>
    %240 = arith.mulf %239, %238 : vector<16x16xf32>
    %241 = arith.addf %231, %240 : vector<16x16xf32>
    %c20 = arith.constant 20 : index
    %242 = memref.load %arg1[%c20] : memref<98xf32, #tpu.memory_space<smem>>
    %243 = vector.extract_strided_slice %182 {offsets = [0, 6], sizes = [16, 16], strides = [1, 1]} : vector<16x22xf32> to vector<16x16xf32>
    %244 = vector.broadcast %242 : f32 to vector<16x16xf32>
    %245 = arith.mulf %244, %243 : vector<16x16xf32>
    %246 = arith.addf %236, %245 : vector<16x16xf32>
    %c69 = arith.constant 69 : index
    %247 = memref.load %arg1[%c69] : memref<98xf32, #tpu.memory_space<smem>>
    %248 = vector.extract_strided_slice %183 {offsets = [0, 6], sizes = [16, 16], strides = [1, 1]} : vector<16x22xf32> to vector<16x16xf32>
    %249 = vector.broadcast %247 : f32 to vector<16x16xf32>
    %250 = arith.mulf %249, %248 : vector<16x16xf32>
    %251 = arith.addf %241, %250 : vector<16x16xf32>
    %c3_43 = arith.constant 3 : index
    %c0_44 = arith.constant 0 : index
    %252 = vector.load %arg6[%c3_43, %c0_44] : memref<22x22xf32, #tpu.memory_space<vmem>>, vector<16x22xf32>
    %c3_45 = arith.constant 3 : index
    %c0_46 = arith.constant 0 : index
    %253 = vector.load %arg7[%c3_45, %c0_46] : memref<22x22xf32, #tpu.memory_space<vmem>>, vector<16x22xf32>
    %c21 = arith.constant 21 : index
    %254 = memref.load %arg1[%c21] : memref<98xf32, #tpu.memory_space<smem>>
    %255 = vector.extract_strided_slice %252 {offsets = [0, 0], sizes = [16, 16], strides = [1, 1]} : vector<16x22xf32> to vector<16x16xf32>
    %256 = vector.broadcast %254 : f32 to vector<16x16xf32>
    %257 = arith.mulf %256, %255 : vector<16x16xf32>
    %c70 = arith.constant 70 : index
    %258 = memref.load %arg1[%c70] : memref<98xf32, #tpu.memory_space<smem>>
    %259 = vector.extract_strided_slice %253 {offsets = [0, 0], sizes = [16, 16], strides = [1, 1]} : vector<16x22xf32> to vector<16x16xf32>
    %260 = vector.broadcast %258 : f32 to vector<16x16xf32>
    %261 = arith.mulf %260, %259 : vector<16x16xf32>
    %c22 = arith.constant 22 : index
    %262 = memref.load %arg1[%c22] : memref<98xf32, #tpu.memory_space<smem>>
    %263 = vector.extract_strided_slice %252 {offsets = [0, 1], sizes = [16, 16], strides = [1, 1]} : vector<16x22xf32> to vector<16x16xf32>
    %264 = vector.broadcast %262 : f32 to vector<16x16xf32>
    %265 = arith.mulf %264, %263 : vector<16x16xf32>
    %266 = arith.addf %257, %265 : vector<16x16xf32>
    %c71 = arith.constant 71 : index
    %267 = memref.load %arg1[%c71] : memref<98xf32, #tpu.memory_space<smem>>
    %268 = vector.extract_strided_slice %253 {offsets = [0, 1], sizes = [16, 16], strides = [1, 1]} : vector<16x22xf32> to vector<16x16xf32>
    %269 = vector.broadcast %267 : f32 to vector<16x16xf32>
    %270 = arith.mulf %269, %268 : vector<16x16xf32>
    %271 = arith.addf %261, %270 : vector<16x16xf32>
    %c23 = arith.constant 23 : index
    %272 = memref.load %arg1[%c23] : memref<98xf32, #tpu.memory_space<smem>>
    %273 = vector.extract_strided_slice %252 {offsets = [0, 2], sizes = [16, 16], strides = [1, 1]} : vector<16x22xf32> to vector<16x16xf32>
    %274 = vector.broadcast %272 : f32 to vector<16x16xf32>
    %275 = arith.mulf %274, %273 : vector<16x16xf32>
    %276 = arith.addf %266, %275 : vector<16x16xf32>
    %c72 = arith.constant 72 : index
    %277 = memref.load %arg1[%c72] : memref<98xf32, #tpu.memory_space<smem>>
    %278 = vector.extract_strided_slice %253 {offsets = [0, 2], sizes = [16, 16], strides = [1, 1]} : vector<16x22xf32> to vector<16x16xf32>
    %279 = vector.broadcast %277 : f32 to vector<16x16xf32>
    %280 = arith.mulf %279, %278 : vector<16x16xf32>
    %281 = arith.addf %271, %280 : vector<16x16xf32>
    %c24 = arith.constant 24 : index
    %282 = memref.load %arg1[%c24] : memref<98xf32, #tpu.memory_space<smem>>
    %283 = vector.extract_strided_slice %252 {offsets = [0, 3], sizes = [16, 16], strides = [1, 1]} : vector<16x22xf32> to vector<16x16xf32>
    %284 = vector.broadcast %282 : f32 to vector<16x16xf32>
    %285 = arith.mulf %284, %283 : vector<16x16xf32>
    %286 = arith.addf %276, %285 : vector<16x16xf32>
    %c73 = arith.constant 73 : index
    %287 = memref.load %arg1[%c73] : memref<98xf32, #tpu.memory_space<smem>>
    %288 = vector.extract_strided_slice %253 {offsets = [0, 3], sizes = [16, 16], strides = [1, 1]} : vector<16x22xf32> to vector<16x16xf32>
    %289 = vector.broadcast %287 : f32 to vector<16x16xf32>
    %290 = arith.mulf %289, %288 : vector<16x16xf32>
    %291 = arith.addf %281, %290 : vector<16x16xf32>
    %c25 = arith.constant 25 : index
    %292 = memref.load %arg1[%c25] : memref<98xf32, #tpu.memory_space<smem>>
    %293 = vector.extract_strided_slice %252 {offsets = [0, 4], sizes = [16, 16], strides = [1, 1]} : vector<16x22xf32> to vector<16x16xf32>
    %294 = vector.broadcast %292 : f32 to vector<16x16xf32>
    %295 = arith.mulf %294, %293 : vector<16x16xf32>
    %296 = arith.addf %286, %295 : vector<16x16xf32>
    %c74 = arith.constant 74 : index
    %297 = memref.load %arg1[%c74] : memref<98xf32, #tpu.memory_space<smem>>
    %298 = vector.extract_strided_slice %253 {offsets = [0, 4], sizes = [16, 16], strides = [1, 1]} : vector<16x22xf32> to vector<16x16xf32>
    %299 = vector.broadcast %297 : f32 to vector<16x16xf32>
    %300 = arith.mulf %299, %298 : vector<16x16xf32>
    %301 = arith.addf %291, %300 : vector<16x16xf32>
    %c26 = arith.constant 26 : index
    %302 = memref.load %arg1[%c26] : memref<98xf32, #tpu.memory_space<smem>>
    %303 = vector.extract_strided_slice %252 {offsets = [0, 5], sizes = [16, 16], strides = [1, 1]} : vector<16x22xf32> to vector<16x16xf32>
    %304 = vector.broadcast %302 : f32 to vector<16x16xf32>
    %305 = arith.mulf %304, %303 : vector<16x16xf32>
    %306 = arith.addf %296, %305 : vector<16x16xf32>
    %c75 = arith.constant 75 : index
    %307 = memref.load %arg1[%c75] : memref<98xf32, #tpu.memory_space<smem>>
    %308 = vector.extract_strided_slice %253 {offsets = [0, 5], sizes = [16, 16], strides = [1, 1]} : vector<16x22xf32> to vector<16x16xf32>
    %309 = vector.broadcast %307 : f32 to vector<16x16xf32>
    %310 = arith.mulf %309, %308 : vector<16x16xf32>
    %311 = arith.addf %301, %310 : vector<16x16xf32>
    %c27 = arith.constant 27 : index
    %312 = memref.load %arg1[%c27] : memref<98xf32, #tpu.memory_space<smem>>
    %313 = vector.extract_strided_slice %252 {offsets = [0, 6], sizes = [16, 16], strides = [1, 1]} : vector<16x22xf32> to vector<16x16xf32>
    %314 = vector.broadcast %312 : f32 to vector<16x16xf32>
    %315 = arith.mulf %314, %313 : vector<16x16xf32>
    %316 = arith.addf %306, %315 : vector<16x16xf32>
    %c76 = arith.constant 76 : index
    %317 = memref.load %arg1[%c76] : memref<98xf32, #tpu.memory_space<smem>>
    %318 = vector.extract_strided_slice %253 {offsets = [0, 6], sizes = [16, 16], strides = [1, 1]} : vector<16x22xf32> to vector<16x16xf32>
    %319 = vector.broadcast %317 : f32 to vector<16x16xf32>
    %320 = arith.mulf %319, %318 : vector<16x16xf32>
    %321 = arith.addf %311, %320 : vector<16x16xf32>
    %c4_47 = arith.constant 4 : index
    %c0_48 = arith.constant 0 : index
    %322 = vector.load %arg6[%c4_47, %c0_48] : memref<22x22xf32, #tpu.memory_space<vmem>>, vector<16x22xf32>
    %c4_49 = arith.constant 4 : index
    %c0_50 = arith.constant 0 : index
    %323 = vector.load %arg7[%c4_49, %c0_50] : memref<22x22xf32, #tpu.memory_space<vmem>>, vector<16x22xf32>
    %c28 = arith.constant 28 : index
    %324 = memref.load %arg1[%c28] : memref<98xf32, #tpu.memory_space<smem>>
    %325 = vector.extract_strided_slice %322 {offsets = [0, 0], sizes = [16, 16], strides = [1, 1]} : vector<16x22xf32> to vector<16x16xf32>
    %326 = vector.broadcast %324 : f32 to vector<16x16xf32>
    %327 = arith.mulf %326, %325 : vector<16x16xf32>
    %c77 = arith.constant 77 : index
    %328 = memref.load %arg1[%c77] : memref<98xf32, #tpu.memory_space<smem>>
    %329 = vector.extract_strided_slice %323 {offsets = [0, 0], sizes = [16, 16], strides = [1, 1]} : vector<16x22xf32> to vector<16x16xf32>
    %330 = vector.broadcast %328 : f32 to vector<16x16xf32>
    %331 = arith.mulf %330, %329 : vector<16x16xf32>
    %c29 = arith.constant 29 : index
    %332 = memref.load %arg1[%c29] : memref<98xf32, #tpu.memory_space<smem>>
    %333 = vector.extract_strided_slice %322 {offsets = [0, 1], sizes = [16, 16], strides = [1, 1]} : vector<16x22xf32> to vector<16x16xf32>
    %334 = vector.broadcast %332 : f32 to vector<16x16xf32>
    %335 = arith.mulf %334, %333 : vector<16x16xf32>
    %336 = arith.addf %327, %335 : vector<16x16xf32>
    %c78 = arith.constant 78 : index
    %337 = memref.load %arg1[%c78] : memref<98xf32, #tpu.memory_space<smem>>
    %338 = vector.extract_strided_slice %323 {offsets = [0, 1], sizes = [16, 16], strides = [1, 1]} : vector<16x22xf32> to vector<16x16xf32>
    %339 = vector.broadcast %337 : f32 to vector<16x16xf32>
    %340 = arith.mulf %339, %338 : vector<16x16xf32>
    %341 = arith.addf %331, %340 : vector<16x16xf32>
    %c30 = arith.constant 30 : index
    %342 = memref.load %arg1[%c30] : memref<98xf32, #tpu.memory_space<smem>>
    %343 = vector.extract_strided_slice %322 {offsets = [0, 2], sizes = [16, 16], strides = [1, 1]} : vector<16x22xf32> to vector<16x16xf32>
    %344 = vector.broadcast %342 : f32 to vector<16x16xf32>
    %345 = arith.mulf %344, %343 : vector<16x16xf32>
    %346 = arith.addf %336, %345 : vector<16x16xf32>
    %c79 = arith.constant 79 : index
    %347 = memref.load %arg1[%c79] : memref<98xf32, #tpu.memory_space<smem>>
    %348 = vector.extract_strided_slice %323 {offsets = [0, 2], sizes = [16, 16], strides = [1, 1]} : vector<16x22xf32> to vector<16x16xf32>
    %349 = vector.broadcast %347 : f32 to vector<16x16xf32>
    %350 = arith.mulf %349, %348 : vector<16x16xf32>
    %351 = arith.addf %341, %350 : vector<16x16xf32>
    %c31 = arith.constant 31 : index
    %352 = memref.load %arg1[%c31] : memref<98xf32, #tpu.memory_space<smem>>
    %353 = vector.extract_strided_slice %322 {offsets = [0, 3], sizes = [16, 16], strides = [1, 1]} : vector<16x22xf32> to vector<16x16xf32>
    %354 = vector.broadcast %352 : f32 to vector<16x16xf32>
    %355 = arith.mulf %354, %353 : vector<16x16xf32>
    %356 = arith.addf %346, %355 : vector<16x16xf32>
    %c80 = arith.constant 80 : index
    %357 = memref.load %arg1[%c80] : memref<98xf32, #tpu.memory_space<smem>>
    %358 = vector.extract_strided_slice %323 {offsets = [0, 3], sizes = [16, 16], strides = [1, 1]} : vector<16x22xf32> to vector<16x16xf32>
    %359 = vector.broadcast %357 : f32 to vector<16x16xf32>
    %360 = arith.mulf %359, %358 : vector<16x16xf32>
    %361 = arith.addf %351, %360 : vector<16x16xf32>
    %c32 = arith.constant 32 : index
    %362 = memref.load %arg1[%c32] : memref<98xf32, #tpu.memory_space<smem>>
    %363 = vector.extract_strided_slice %322 {offsets = [0, 4], sizes = [16, 16], strides = [1, 1]} : vector<16x22xf32> to vector<16x16xf32>
    %364 = vector.broadcast %362 : f32 to vector<16x16xf32>
    %365 = arith.mulf %364, %363 : vector<16x16xf32>
    %366 = arith.addf %356, %365 : vector<16x16xf32>
    %c81 = arith.constant 81 : index
    %367 = memref.load %arg1[%c81] : memref<98xf32, #tpu.memory_space<smem>>
    %368 = vector.extract_strided_slice %323 {offsets = [0, 4], sizes = [16, 16], strides = [1, 1]} : vector<16x22xf32> to vector<16x16xf32>
    %369 = vector.broadcast %367 : f32 to vector<16x16xf32>
    %370 = arith.mulf %369, %368 : vector<16x16xf32>
    %371 = arith.addf %361, %370 : vector<16x16xf32>
    %c33 = arith.constant 33 : index
    %372 = memref.load %arg1[%c33] : memref<98xf32, #tpu.memory_space<smem>>
    %373 = vector.extract_strided_slice %322 {offsets = [0, 5], sizes = [16, 16], strides = [1, 1]} : vector<16x22xf32> to vector<16x16xf32>
    %374 = vector.broadcast %372 : f32 to vector<16x16xf32>
    %375 = arith.mulf %374, %373 : vector<16x16xf32>
    %376 = arith.addf %366, %375 : vector<16x16xf32>
    %c82 = arith.constant 82 : index
    %377 = memref.load %arg1[%c82] : memref<98xf32, #tpu.memory_space<smem>>
    %378 = vector.extract_strided_slice %323 {offsets = [0, 5], sizes = [16, 16], strides = [1, 1]} : vector<16x22xf32> to vector<16x16xf32>
    %379 = vector.broadcast %377 : f32 to vector<16x16xf32>
    %380 = arith.mulf %379, %378 : vector<16x16xf32>
    %381 = arith.addf %371, %380 : vector<16x16xf32>
    %c34 = arith.constant 34 : index
    %382 = memref.load %arg1[%c34] : memref<98xf32, #tpu.memory_space<smem>>
    %383 = vector.extract_strided_slice %322 {offsets = [0, 6], sizes = [16, 16], strides = [1, 1]} : vector<16x22xf32> to vector<16x16xf32>
    %384 = vector.broadcast %382 : f32 to vector<16x16xf32>
    %385 = arith.mulf %384, %383 : vector<16x16xf32>
    %386 = arith.addf %376, %385 : vector<16x16xf32>
    %c83 = arith.constant 83 : index
    %387 = memref.load %arg1[%c83] : memref<98xf32, #tpu.memory_space<smem>>
    %388 = vector.extract_strided_slice %323 {offsets = [0, 6], sizes = [16, 16], strides = [1, 1]} : vector<16x22xf32> to vector<16x16xf32>
    %389 = vector.broadcast %387 : f32 to vector<16x16xf32>
    %390 = arith.mulf %389, %388 : vector<16x16xf32>
    %391 = arith.addf %381, %390 : vector<16x16xf32>
    %c5_51 = arith.constant 5 : index
    %c0_52 = arith.constant 0 : index
    %392 = vector.load %arg6[%c5_51, %c0_52] : memref<22x22xf32, #tpu.memory_space<vmem>>, vector<16x22xf32>
    %c5_53 = arith.constant 5 : index
    %c0_54 = arith.constant 0 : index
    %393 = vector.load %arg7[%c5_53, %c0_54] : memref<22x22xf32, #tpu.memory_space<vmem>>, vector<16x22xf32>
    %c35 = arith.constant 35 : index
    %394 = memref.load %arg1[%c35] : memref<98xf32, #tpu.memory_space<smem>>
    %395 = vector.extract_strided_slice %392 {offsets = [0, 0], sizes = [16, 16], strides = [1, 1]} : vector<16x22xf32> to vector<16x16xf32>
    %396 = vector.broadcast %394 : f32 to vector<16x16xf32>
    %397 = arith.mulf %396, %395 : vector<16x16xf32>
    %c84 = arith.constant 84 : index
    %398 = memref.load %arg1[%c84] : memref<98xf32, #tpu.memory_space<smem>>
    %399 = vector.extract_strided_slice %393 {offsets = [0, 0], sizes = [16, 16], strides = [1, 1]} : vector<16x22xf32> to vector<16x16xf32>
    %400 = vector.broadcast %398 : f32 to vector<16x16xf32>
    %401 = arith.mulf %400, %399 : vector<16x16xf32>
    %c36 = arith.constant 36 : index
    %402 = memref.load %arg1[%c36] : memref<98xf32, #tpu.memory_space<smem>>
    %403 = vector.extract_strided_slice %392 {offsets = [0, 1], sizes = [16, 16], strides = [1, 1]} : vector<16x22xf32> to vector<16x16xf32>
    %404 = vector.broadcast %402 : f32 to vector<16x16xf32>
    %405 = arith.mulf %404, %403 : vector<16x16xf32>
    %406 = arith.addf %397, %405 : vector<16x16xf32>
    %c85 = arith.constant 85 : index
    %407 = memref.load %arg1[%c85] : memref<98xf32, #tpu.memory_space<smem>>
    %408 = vector.extract_strided_slice %393 {offsets = [0, 1], sizes = [16, 16], strides = [1, 1]} : vector<16x22xf32> to vector<16x16xf32>
    %409 = vector.broadcast %407 : f32 to vector<16x16xf32>
    %410 = arith.mulf %409, %408 : vector<16x16xf32>
    %411 = arith.addf %401, %410 : vector<16x16xf32>
    %c37 = arith.constant 37 : index
    %412 = memref.load %arg1[%c37] : memref<98xf32, #tpu.memory_space<smem>>
    %413 = vector.extract_strided_slice %392 {offsets = [0, 2], sizes = [16, 16], strides = [1, 1]} : vector<16x22xf32> to vector<16x16xf32>
    %414 = vector.broadcast %412 : f32 to vector<16x16xf32>
    %415 = arith.mulf %414, %413 : vector<16x16xf32>
    %416 = arith.addf %406, %415 : vector<16x16xf32>
    %c86 = arith.constant 86 : index
    %417 = memref.load %arg1[%c86] : memref<98xf32, #tpu.memory_space<smem>>
    %418 = vector.extract_strided_slice %393 {offsets = [0, 2], sizes = [16, 16], strides = [1, 1]} : vector<16x22xf32> to vector<16x16xf32>
    %419 = vector.broadcast %417 : f32 to vector<16x16xf32>
    %420 = arith.mulf %419, %418 : vector<16x16xf32>
    %421 = arith.addf %411, %420 : vector<16x16xf32>
    %c38 = arith.constant 38 : index
    %422 = memref.load %arg1[%c38] : memref<98xf32, #tpu.memory_space<smem>>
    %423 = vector.extract_strided_slice %392 {offsets = [0, 3], sizes = [16, 16], strides = [1, 1]} : vector<16x22xf32> to vector<16x16xf32>
    %424 = vector.broadcast %422 : f32 to vector<16x16xf32>
    %425 = arith.mulf %424, %423 : vector<16x16xf32>
    %426 = arith.addf %416, %425 : vector<16x16xf32>
    %c87 = arith.constant 87 : index
    %427 = memref.load %arg1[%c87] : memref<98xf32, #tpu.memory_space<smem>>
    %428 = vector.extract_strided_slice %393 {offsets = [0, 3], sizes = [16, 16], strides = [1, 1]} : vector<16x22xf32> to vector<16x16xf32>
    %429 = vector.broadcast %427 : f32 to vector<16x16xf32>
    %430 = arith.mulf %429, %428 : vector<16x16xf32>
    %431 = arith.addf %421, %430 : vector<16x16xf32>
    %c39 = arith.constant 39 : index
    %432 = memref.load %arg1[%c39] : memref<98xf32, #tpu.memory_space<smem>>
    %433 = vector.extract_strided_slice %392 {offsets = [0, 4], sizes = [16, 16], strides = [1, 1]} : vector<16x22xf32> to vector<16x16xf32>
    %434 = vector.broadcast %432 : f32 to vector<16x16xf32>
    %435 = arith.mulf %434, %433 : vector<16x16xf32>
    %436 = arith.addf %426, %435 : vector<16x16xf32>
    %c88 = arith.constant 88 : index
    %437 = memref.load %arg1[%c88] : memref<98xf32, #tpu.memory_space<smem>>
    %438 = vector.extract_strided_slice %393 {offsets = [0, 4], sizes = [16, 16], strides = [1, 1]} : vector<16x22xf32> to vector<16x16xf32>
    %439 = vector.broadcast %437 : f32 to vector<16x16xf32>
    %440 = arith.mulf %439, %438 : vector<16x16xf32>
    %441 = arith.addf %431, %440 : vector<16x16xf32>
    %c40 = arith.constant 40 : index
    %442 = memref.load %arg1[%c40] : memref<98xf32, #tpu.memory_space<smem>>
    %443 = vector.extract_strided_slice %392 {offsets = [0, 5], sizes = [16, 16], strides = [1, 1]} : vector<16x22xf32> to vector<16x16xf32>
    %444 = vector.broadcast %442 : f32 to vector<16x16xf32>
    %445 = arith.mulf %444, %443 : vector<16x16xf32>
    %446 = arith.addf %436, %445 : vector<16x16xf32>
    %c89 = arith.constant 89 : index
    %447 = memref.load %arg1[%c89] : memref<98xf32, #tpu.memory_space<smem>>
    %448 = vector.extract_strided_slice %393 {offsets = [0, 5], sizes = [16, 16], strides = [1, 1]} : vector<16x22xf32> to vector<16x16xf32>
    %449 = vector.broadcast %447 : f32 to vector<16x16xf32>
    %450 = arith.mulf %449, %448 : vector<16x16xf32>
    %451 = arith.addf %441, %450 : vector<16x16xf32>
    %c41 = arith.constant 41 : index
    %452 = memref.load %arg1[%c41] : memref<98xf32, #tpu.memory_space<smem>>
    %453 = vector.extract_strided_slice %392 {offsets = [0, 6], sizes = [16, 16], strides = [1, 1]} : vector<16x22xf32> to vector<16x16xf32>
    %454 = vector.broadcast %452 : f32 to vector<16x16xf32>
    %455 = arith.mulf %454, %453 : vector<16x16xf32>
    %456 = arith.addf %446, %455 : vector<16x16xf32>
    %c90 = arith.constant 90 : index
    %457 = memref.load %arg1[%c90] : memref<98xf32, #tpu.memory_space<smem>>
    %458 = vector.extract_strided_slice %393 {offsets = [0, 6], sizes = [16, 16], strides = [1, 1]} : vector<16x22xf32> to vector<16x16xf32>
    %459 = vector.broadcast %457 : f32 to vector<16x16xf32>
    %460 = arith.mulf %459, %458 : vector<16x16xf32>
    %461 = arith.addf %451, %460 : vector<16x16xf32>
    %c6_55 = arith.constant 6 : index
    %c0_56 = arith.constant 0 : index
    %462 = vector.load %arg6[%c6_55, %c0_56] : memref<22x22xf32, #tpu.memory_space<vmem>>, vector<16x22xf32>
    %c6_57 = arith.constant 6 : index
    %c0_58 = arith.constant 0 : index
    %463 = vector.load %arg7[%c6_57, %c0_58] : memref<22x22xf32, #tpu.memory_space<vmem>>, vector<16x22xf32>
    %c42 = arith.constant 42 : index
    %464 = memref.load %arg1[%c42] : memref<98xf32, #tpu.memory_space<smem>>
    %465 = vector.extract_strided_slice %462 {offsets = [0, 0], sizes = [16, 16], strides = [1, 1]} : vector<16x22xf32> to vector<16x16xf32>
    %466 = vector.broadcast %464 : f32 to vector<16x16xf32>
    %467 = arith.mulf %466, %465 : vector<16x16xf32>
    %c91 = arith.constant 91 : index
    %468 = memref.load %arg1[%c91] : memref<98xf32, #tpu.memory_space<smem>>
    %469 = vector.extract_strided_slice %463 {offsets = [0, 0], sizes = [16, 16], strides = [1, 1]} : vector<16x22xf32> to vector<16x16xf32>
    %470 = vector.broadcast %468 : f32 to vector<16x16xf32>
    %471 = arith.mulf %470, %469 : vector<16x16xf32>
    %c43 = arith.constant 43 : index
    %472 = memref.load %arg1[%c43] : memref<98xf32, #tpu.memory_space<smem>>
    %473 = vector.extract_strided_slice %462 {offsets = [0, 1], sizes = [16, 16], strides = [1, 1]} : vector<16x22xf32> to vector<16x16xf32>
    %474 = vector.broadcast %472 : f32 to vector<16x16xf32>
    %475 = arith.mulf %474, %473 : vector<16x16xf32>
    %476 = arith.addf %467, %475 : vector<16x16xf32>
    %c92 = arith.constant 92 : index
    %477 = memref.load %arg1[%c92] : memref<98xf32, #tpu.memory_space<smem>>
    %478 = vector.extract_strided_slice %463 {offsets = [0, 1], sizes = [16, 16], strides = [1, 1]} : vector<16x22xf32> to vector<16x16xf32>
    %479 = vector.broadcast %477 : f32 to vector<16x16xf32>
    %480 = arith.mulf %479, %478 : vector<16x16xf32>
    %481 = arith.addf %471, %480 : vector<16x16xf32>
    %c44 = arith.constant 44 : index
    %482 = memref.load %arg1[%c44] : memref<98xf32, #tpu.memory_space<smem>>
    %483 = vector.extract_strided_slice %462 {offsets = [0, 2], sizes = [16, 16], strides = [1, 1]} : vector<16x22xf32> to vector<16x16xf32>
    %484 = vector.broadcast %482 : f32 to vector<16x16xf32>
    %485 = arith.mulf %484, %483 : vector<16x16xf32>
    %486 = arith.addf %476, %485 : vector<16x16xf32>
    %c93 = arith.constant 93 : index
    %487 = memref.load %arg1[%c93] : memref<98xf32, #tpu.memory_space<smem>>
    %488 = vector.extract_strided_slice %463 {offsets = [0, 2], sizes = [16, 16], strides = [1, 1]} : vector<16x22xf32> to vector<16x16xf32>
    %489 = vector.broadcast %487 : f32 to vector<16x16xf32>
    %490 = arith.mulf %489, %488 : vector<16x16xf32>
    %491 = arith.addf %481, %490 : vector<16x16xf32>
    %c45 = arith.constant 45 : index
    %492 = memref.load %arg1[%c45] : memref<98xf32, #tpu.memory_space<smem>>
    %493 = vector.extract_strided_slice %462 {offsets = [0, 3], sizes = [16, 16], strides = [1, 1]} : vector<16x22xf32> to vector<16x16xf32>
    %494 = vector.broadcast %492 : f32 to vector<16x16xf32>
    %495 = arith.mulf %494, %493 : vector<16x16xf32>
    %496 = arith.addf %486, %495 : vector<16x16xf32>
    %c94 = arith.constant 94 : index
    %497 = memref.load %arg1[%c94] : memref<98xf32, #tpu.memory_space<smem>>
    %498 = vector.extract_strided_slice %463 {offsets = [0, 3], sizes = [16, 16], strides = [1, 1]} : vector<16x22xf32> to vector<16x16xf32>
    %499 = vector.broadcast %497 : f32 to vector<16x16xf32>
    %500 = arith.mulf %499, %498 : vector<16x16xf32>
    %501 = arith.addf %491, %500 : vector<16x16xf32>
    %c46 = arith.constant 46 : index
    %502 = memref.load %arg1[%c46] : memref<98xf32, #tpu.memory_space<smem>>
    %503 = vector.extract_strided_slice %462 {offsets = [0, 4], sizes = [16, 16], strides = [1, 1]} : vector<16x22xf32> to vector<16x16xf32>
    %504 = vector.broadcast %502 : f32 to vector<16x16xf32>
    %505 = arith.mulf %504, %503 : vector<16x16xf32>
    %506 = arith.addf %496, %505 : vector<16x16xf32>
    %c95 = arith.constant 95 : index
    %507 = memref.load %arg1[%c95] : memref<98xf32, #tpu.memory_space<smem>>
    %508 = vector.extract_strided_slice %463 {offsets = [0, 4], sizes = [16, 16], strides = [1, 1]} : vector<16x22xf32> to vector<16x16xf32>
    %509 = vector.broadcast %507 : f32 to vector<16x16xf32>
    %510 = arith.mulf %509, %508 : vector<16x16xf32>
    %511 = arith.addf %501, %510 : vector<16x16xf32>
    %c47 = arith.constant 47 : index
    %512 = memref.load %arg1[%c47] : memref<98xf32, #tpu.memory_space<smem>>
    %513 = vector.extract_strided_slice %462 {offsets = [0, 5], sizes = [16, 16], strides = [1, 1]} : vector<16x22xf32> to vector<16x16xf32>
    %514 = vector.broadcast %512 : f32 to vector<16x16xf32>
    %515 = arith.mulf %514, %513 : vector<16x16xf32>
    %516 = arith.addf %506, %515 : vector<16x16xf32>
    %c96 = arith.constant 96 : index
    %517 = memref.load %arg1[%c96] : memref<98xf32, #tpu.memory_space<smem>>
    %518 = vector.extract_strided_slice %463 {offsets = [0, 5], sizes = [16, 16], strides = [1, 1]} : vector<16x22xf32> to vector<16x16xf32>
    %519 = vector.broadcast %517 : f32 to vector<16x16xf32>
    %520 = arith.mulf %519, %518 : vector<16x16xf32>
    %521 = arith.addf %511, %520 : vector<16x16xf32>
    %c48 = arith.constant 48 : index
    %522 = memref.load %arg1[%c48] : memref<98xf32, #tpu.memory_space<smem>>
    %523 = vector.extract_strided_slice %462 {offsets = [0, 6], sizes = [16, 16], strides = [1, 1]} : vector<16x22xf32> to vector<16x16xf32>
    %524 = vector.broadcast %522 : f32 to vector<16x16xf32>
    %525 = arith.mulf %524, %523 : vector<16x16xf32>
    %526 = arith.addf %516, %525 : vector<16x16xf32>
    %c97 = arith.constant 97 : index
    %527 = memref.load %arg1[%c97] : memref<98xf32, #tpu.memory_space<smem>>
    %528 = vector.extract_strided_slice %463 {offsets = [0, 6], sizes = [16, 16], strides = [1, 1]} : vector<16x22xf32> to vector<16x16xf32>
    %529 = vector.broadcast %527 : f32 to vector<16x16xf32>
    %530 = arith.mulf %529, %528 : vector<16x16xf32>
    %531 = arith.addf %521, %530 : vector<16x16xf32>
    %532 = arith.addf %106, %111 : vector<16x16xf32>
    %533 = arith.addf %176, %181 : vector<16x16xf32>
    %534 = arith.addf %246, %251 : vector<16x16xf32>
    %535 = arith.addf %316, %321 : vector<16x16xf32>
    %536 = arith.addf %386, %391 : vector<16x16xf32>
    %537 = arith.addf %456, %461 : vector<16x16xf32>
    %538 = arith.addf %526, %531 : vector<16x16xf32>
    %539 = arith.addf %532, %533 : vector<16x16xf32>
    %540 = arith.addf %534, %535 : vector<16x16xf32>
    %541 = arith.addf %536, %537 : vector<16x16xf32>
    %542 = arith.addf %539, %540 : vector<16x16xf32>
    %543 = arith.addf %541, %538 : vector<16x16xf32>
    %544 = arith.addf %542, %543 : vector<16x16xf32>
    %545 = vector.broadcast %10 : f32 to vector<16x16xf32>
    %546 = arith.addf %544, %545 : vector<16x16xf32>
    %547 = arith.negf %546 : vector<16x16xf32>
    %548 = math.exp %547 : vector<16x16xf32>
    %cst_59 = arith.constant 1.000000e+00 : f32
    %549 = vector.broadcast %cst_59 : f32 to vector<16x16xf32>
    %550 = arith.addf %549, %548 : vector<16x16xf32>
    %551 = arith.divf %549, %550 : vector<16x16xf32>
    %552 = vector.shape_cast %551 : vector<16x16xf32> to vector<1x16x16xf32>
    %553 = vector.broadcast %552 : vector<1x16x16xf32> to vector<4x16x16xf32>
    %554 = arith.mulf %12, %553 : vector<4x16x16xf32>
    %555 = arith.addf %14, %554 : vector<4x16x16xf32>
    %c0_60 = arith.constant 0 : index
    %c0_61 = arith.constant 0 : index
    %c0_62 = arith.constant 0 : index
    %c0_63 = arith.constant 0 : index
    %556 = vector.load %arg5[%c0_60, %c0_61, %c0_62, %c0_63] : memref<1x4x16x16xf32, #tpu.memory_space<vmem>>, vector<1x4x16x16xf32>
    %557 = vector.shape_cast %556 : vector<1x4x16x16xf32> to vector<4x16x16xf32>
    %558 = vector.shape_cast %555 : vector<4x16x16xf32> to vector<1x4x16x16xf32>
    tpu.vector_store %arg5[%c0_60, %c0_61, %c0_62, %c0_63], %558 {strides = array<i32>} : memref<1x4x16x16xf32, #tpu.memory_space<vmem>>, vector<1x4x16x16xf32>,
    return
  }
  func.func @transform_0(%arg0: i32) -> i32 {
    %c0_i32 = arith.constant 0 : i32
    %c0_i32_0 = arith.constant 0 : i32
    return %c0_i32 : i32
  }
  func.func @transform_1(%arg0: i32) -> i32 {
    %c0_i32 = arith.constant 0 : i32
    %c0_i32_0 = arith.constant 0 : i32
    return %c0_i32 : i32
  }
  func.func @transform_2(%arg0: i32) -> (i32, i32, i32, i32) {
    %c0_i32 = arith.constant 0 : i32
    %c0_i32_0 = arith.constant 0 : i32
    %c0_i32_1 = arith.constant 0 : i32
    %c0_i32_2 = arith.constant 0 : i32
    return %arg0, %c0_i32, %c0_i32_0, %c0_i32_1 : i32, i32, i32, i32
  }
  func.func @transform_3(%arg0: i32) -> (i32, i32, i32, i32) {
    %c0_i32 = arith.constant 0 : i32
    %c0_i32_0 = arith.constant 0 : i32
    %c0_i32_1 = arith.constant 0 : i32
    %c0_i32_2 = arith.constant 0 : i32
    return %arg0, %c0_i32, %c0_i32_0, %c0_i32_1 : i32, i32, i32, i32
  }
  func.func @transform_4(%arg0: i32) -> (i32, i32, i32, i32) {
    %c0_i32 = arith.constant 0 : i32
    %c0_i32_0 = arith.constant 0 : i32
    %c0_i32_1 = arith.constant 0 : i32
    %c0_i32_2 = arith.constant 0 : i32
    return %arg0, %c0_i32, %c0_i32_0, %c0_i32_1 : i32, i32, i32, i32
  }
}

</mosaic_0001>

<bundles_post_ra>
// kernel: ffu.1
= control target key start
LH: loop header
LB: loop body
LE: loop exit
PB: predicated region body
PF: predicated region fallthrough
CT: control target
= control target key end

     0   :  { %s3066_s0 = inlined_call_operand.vmem [shape: f32[98], index: 0, kind: input, shape index: {}]   ;;  %s3067_s1 = inlined_call_operand.<no memory space> [shape: f32[1], index: 1, kind: input, shape index: {}]   ;;  %s3068_s2 = inlined_call_operand.hbm [shape: f32[2,4,16,16], index: 2, kind: input, shape index: {}]   ;;  %s3069_s3 = inlined_call_operand.hbm [shape: f32[2,4,16,16], index: 3, kind: input, shape index: {}]   ;;  %s3070_s4 = inlined_call_operand.hbm [shape: f32[2,4,16,16], index: 4, kind: output, shape index: {}]  }
   0x1   :  { %3072 = sst [smem:[#allocation18_spill]] %s3066_s0 }
   0x2   :  { %9 = sst [smem:[#allocation4]] %s3067_s1 }
   0x3   :  { %10 = vsyncpa [#allocation8], 0 }
   0x4   :  { %11 = vsyncpa [#allocation6], 0 }
   0x5   :  { %13 = vsyncpa [#allocation6 + $0x1], 0 }
   0x6   :  { %14 = vsyncpa [#allocation11], 0 }
   0x7   :  { %16 = vsyncpa [#allocation11 + $0x1], 0 }
   0x8   :  { %17 = vsyncpa [#allocation7], 0 }
   0x9   :  { %19 = vsyncpa [#allocation7 + $0x1], 0  ;;  %s2238_s17 = smov 0   ;;  %s2240_s18 = smov 0  }
   0xa   :  { %s2242_s19 = smov 0   ;;  %s2244_s20 = smov 0  }
   0xb LB: > { %s2259_s1 = sadd.s32 4294967295, %s2195_s20   ;;  %s1826_s21 = sadd.s32 4294967294, %s2195_s20   ;;  %s2195_s20 = sphi %s2244_s20, %s3087_s20   ;;  %s2191_s19 = sphi %s2242_s19, %s3086_s19   ;;  %s2187_s18 = sphi %s2240_s18, %s3085_s18   ;;  %s2183_s17 = sphi %s2238_s17, %s3084_s17  }
   0xc   : > { %s2263_s22 = sadd.s32 1, %s2195_s20   ;;  %s74_s23 = sadd.s32 1, %s2191_s19 }
   0xd   : > { %s71_s24 = ssub.s32 %s2195_s20, %s2263_s22  ;;  %p81_p0 = scmp.ne.s32.totalorder %s2191_s19, %s2187_s18 }
   0xe   : > { %p72_p1 = scmp.eq.s32.totalorder %s71_s24, 0  ;;  %p82_p2 = scmp.eq.s32.totalorder %s2195_s20, 0 }
   0xf   : > { %p87_p3 = scmp.ne.s32.totalorder %s2187_s18, %s2183_s17  ;;  %p88_p4 = scmp.eq.s32.totalorder %s2259_s1, 0 }
  0x10   : > { %s2275_s25 = scalar_select %p72_p1, %s2191_s19, %s74_s23  }
  0x11   : > { %p2277_p5 = por %p82_p2, %p81_p0  ;;  %p2283_p6 = por %p88_p4, %p87_p3 }
  0x12   : > { %3073 = sst [smem:[#allocation17_spill]] %s2275_s25  ;;  %p137_p7 = scmp.eq.s32.totalorder %s2259_s1, 1 }
  0x13   : > { %p143_p8 = scmp.eq.s32.totalorder %s1826_s21, 1  ;;  %p1827_p9 = scmp.ge.s32.totalorder %s2195_s20, 1 }
  0x14   : > { %p150_p10 = scmp.lt.s32.totalorder %s2195_s20, 3  ;;  %p2290_p11 = por %p137_p7, %p81_p0 }
  0x15   : > { %p2294_p12 = por %p143_p8, %p87_p3  ;;  %s3079_s0 = sld [smem:[#allocation18_spill]] }
  0x16   : > { %p2298_p13 = pnand %p1827_p9, %p150_p10  ;;  %p1974_p2 = scmp.lt.s32.totalorder %s2195_s20, 2 }
  0x17   : > { %s2312_s8 = sand.u32 1, %s2191_s19   ;;  %s2197_s11 = smov [#allocation5]  }
  0x18   : > { %p1958_p1 = pneg %p2298_p13  ;;  %p2316_p3 = pnand %p1974_p2, %p2277_p5 }
  0x19   : > { %s3071_s10 = sshll.u32 %s2312_s8, 6  ;;  %s1945_s12 = sshll.u32 %s2195_s20, 6 }
  0x1a   : > { %p1959_p7 = pnand %p1958_p1, %p88_p4  ;;  %s180_s13 = scalar_lea.vmem [#allocation9], %s3071_s10 }
  0x1b   : > { %s162_s7 = sshll.u32 %s3079_s0, 4  ;;  %s188_s14 = sshll.u32 %s180_s13, 4  ;;  %s163_s7 = int_to_ptr.vmem [resolvable:$true] %s162_s7  ;;  %s189_s14 = int_to_ptr.vmem [resolvable:$true] %s188_s14 }
  0x1c   : > { %1961 = dma.vmem_to_smem (!%p1959_p7), %s163_s7, 16, %s2197_s11, [#allocation8]  }
  0x1d   : > { %s185_s21 = scalar_lea.hbm %s3068_s2, %s1945_s12  ;;  %s177_s24 = scalar_lea.sflag [#allocation6], %s2312_s8 }
  0x1e   : > { %s186_s23 = sshll.u32 %s185_s21, 4  ;;  %p2065_p8 = pneg %p2316_p3  ;;  %s187_s23 = int_to_ptr.hbm [resolvable:$true] %s186_s23 }
  0x1f   : > { %s2061_s26 = sshra.s32 %s187_s23, 4  ;;  %s2068_s11 = scalar_lea.hbm %s3068_s2, 128  ;;  %s2062_s26 = int_to_ptr.hbm [resolvable:$true] %s2061_s26 }
  0x20   : > { %s2063_s5 = scalar_lea.hbm %s2062_s26, 64  ;;  %p2069_p1 = scmp.lt.s32.totalorder %s2062_s26, %s3068_s2 }
  0x21   : > { %p2064_p5 = scmp.ne.s32.totalorder %s2062_s26, %s2063_s5  ;;  %p2070_p2 = scmp.lt.s32.totalorder %s2068_s11, %s2063_s5 }
  0x23   : > { %p2066_p9 = pnand %p2065_p8, %p2064_p5  ;;  %p2071_p7 = por %p2070_p2, %p2069_p1 }
  0x25   : > { %p2067_p10 = pneg %p2066_p9 }
  0x27   : > { %p2072_p0 = pnand %p2071_p7, %p2067_p10 }
  0x29   : > { %2075 = shalt.err (!%p2072_p0)
}
  0x2a   : > { %s2198_s16 = smov 128   ;;  %s2199_s21 = smov 8  }
  0x2b   : > { %1965 = dma.hbm_to_vmem [thread:$0]  (!%p2316_p3), %s187_s23, 1024, %s189_s14, %s177_s24, %s2198_s16, %s2198_s16, %s2199_s21  }
  0x2c   : > { %s207_s6 = scalar_lea.hbm %s3069_s3, %s1945_s12  ;;  %s3081_s7 = sshll.u32 %s2312_s8, 6 }
  0x2d   : > { %s202_s25 = scalar_lea.vmem [#allocation10], %s3081_s7  ;;  %s208_s26 = sshll.u32 %s207_s6, 4  ;;  %s209_s26 = int_to_ptr.hbm [resolvable:$true] %s208_s26 }
  0x2e   : > { %s210_s13 = sshll.u32 %s202_s25, 4  ;;  %s199_s5 = scalar_lea.sflag [#allocation11], %s2312_s8  ;;  %s211_s13 = int_to_ptr.vmem [resolvable:$true] %s210_s13 }
  0x2f   : > { %s2091_s11 = sshra.s32 %s209_s26, 4  ;;  %s2098_s0 = scalar_lea.hbm %s3069_s3, 128  ;;  %s2092_s11 = int_to_ptr.hbm [resolvable:$true] %s2091_s11 }
  0x30   : > { %s2093_s15 = scalar_lea.hbm %s2092_s11, 64  ;;  %p2099_p10 = scmp.lt.s32.totalorder %s2092_s11, %s3069_s3 }
  0x31   : > { %p2094_p0 = scmp.ne.s32.totalorder %s2092_s11, %s2093_s15  ;;  %p2100_p1 = scmp.lt.s32.totalorder %s2098_s0, %s2093_s15 }
  0x33   : > { %p2096_p5 = pnand %p2094_p0, %p2065_p8  ;;  %p2101_p2 = por %p2100_p1, %p2099_p10 }
  0x35   : > { %p2097_p9 = pneg %p2096_p5 }
  0x37   : > { %p2102_p7 = pnand %p2101_p2, %p2097_p9 }
  0x39   : > { %2105 = shalt.err (!%p2102_p7)
}
  0x3a   : > { %1968 = dma.hbm_to_vmem [thread:$0]  (!%p2316_p3), %s209_s26, 1024, %s211_s13, %s199_s5, %s2198_s16, %s2198_s16, %s2199_s21  }
  0x3b   : > { %222 = sbr.rel (%p2298_p13) target bundleno = 822 (0x336), region = 36 }
  0x40   : > { %2166 = dma.done.wait (%p88_p4), [#allocation8], 16  }
  0x41   : > { %2168 = vsyncadd (%p88_p4), [#allocation8], 4294967280  ;;  %s2365_s25 = sand.u32 1, %s2187_s18  }
  0x42   : > { %s2368_s8 = sshll.u32 %s2365_s25, 6  ;;  %s230_s9 = scalar_lea.sflag [#allocation6], %s2365_s25 }
  0x43   : > { %s2372_s24 = scalar_lea.vmem [#allocation9], %s2368_s8 }
  0x44   : > { %2170 = dma.done.wait (%p2283_p6), %s230_s9, 1024  }
  0x45   : > { %2172 = vsyncadd (%p2283_p6), %s230_s9, 4294966272  ;;  %s240_s30 = scalar_lea.sflag [#allocation11], %s2365_s25  ;;  %s2380_s16 = scalar_lea.vmem [#allocation10], %s2368_s8 }
  0x46   : > { %2174 = dma.done.wait (%p2283_p6), %s240_s30, 1024  }
  0x47   : > { %2176 = vsyncadd (%p2283_p6), %s240_s30, 4294966272 }
  0x48   : > { %249 = sfence }
  0x49   : > { %v291_v0 = vld [vmem:[%s2372_s24] sm:$0xff]  ;;  %v293_v1 = vld [vmem:[%s2372_s24 + $0x10] sm:$0xff]  ;;  %v292_v10 = vld [vmem:[%s2372_s24 + $0x8] sm:$0xff]  ;;  %s2200_s27 = smov 3   ;;  %vm278_vm0 = vcmask 23552   ;;  %v2201_v38 = vmov 0.0  }
  0x4a   : > { %v295_v2 = vld [vmem:[%s2372_s24 + $0x20] sm:$0xff]  ;;  %v297_v3 = vld [vmem:[%s2372_s24 + $0x30] sm:$0xff]  ;;  %v294_v12 = vld [vmem:[%s2372_s24 + $0x18] sm:$0xff]  ;;  %279 = vst.msk [vmem:[#allocation2 + $0x3] sm:$0xff] %vm278_vm0, %v2201_v38  ;;  %vm281_vm1 = vcmask 179352   ;;  %vm275_vm2 = vcmask 174080  }
  0x4b   : > { %v299_v4 = vld [vmem:[%s2380_s16] sm:$0xff]  ;;  %v301_v5 = vld [vmem:[%s2380_s16 + $0x10] sm:$0xff]  ;;  %v296_v13 = vld [vmem:[%s2372_s24 + $0x28] sm:$0xff]  ;;  %282 = vst.msk [vmem:[#allocation2 + $0x3] sm:$0xff] %vm281_vm1, %v2201_v38  ;;  %vm337_vm3 = vcmask 154648   ;;  %s1842_s21 = sld [smem:[#allocation5 + $0x1]] }
  0x4c   : > { %v303_v6 = vld [vmem:[%s2380_s16 + $0x20] sm:$0xff]  ;;  %v305_v7 = vld [vmem:[%s2380_s16 + $0x30] sm:$0xff]  ;;  %v307_v8 = vsub.f32 %v291_v0, %v299_v4  ;;  %v309_v9 = vsub.f32 %v293_v1, %v301_v5  ;;  %v300_v16 = vld [vmem:[%s2380_s16 + $0x8] sm:$0xff]  ;;  %280 = vst.msk [vmem:[#allocation2 + $0xb] sm:$0xff] %vm278_vm0, %v2201_v38  ;;  %s1846_s6 = sld [smem:[#allocation5 + $0x3]]  ;;  %s2202_s13 = smov 127  }
  0x4d   : > { %v311_v11 = vsub.f32 %v295_v2, %v303_v6  ;;  %v313_v14 = vsub.f32 %v297_v3, %v305_v7  ;;  %v302_v17 = vld [vmem:[%s2380_s16 + $0x18] sm:$0xff]  ;;  %v304_v18 = vld [vmem:[%s2380_s16 + $0x28] sm:$0xff]  ;;  %v308_v20 = vsub.f32 %v292_v10, %v300_v16  ;;  %286 = vst.msk [vmem:[#allocation3 + $0x3] sm:$0xff] %vm278_vm0, %v2201_v38  ;;  %s1844_s7 = sld [smem:[#allocation5 + $0x2]]  ;;  %s2203_s5 = smov 125   ;;  %vm1693_vm8 = vcmask 130048  }
  0x4e   : > { %v315_v15 = vmax.f32 %v307_v8, %v309_v9  ;;  %v317_v19 = vadd.f32 %v309_v9, %v307_v8  ;;  %v310_v21 = vsub.f32 %v294_v12, %v302_v17  ;;  %v312_v23 = vsub.f32 %v296_v13, %v304_v18  ;;  %v298_v25 = vld [vmem:[%s2372_s24 + $0x38] sm:$0xff]  ;;  %287 = vst.msk [vmem:[#allocation3 + $0xb] sm:$0xff] %vm278_vm0, %v2201_v38  ;;  %s1848_s26 = sld [smem:[#allocation5 + $0x4]]  ;;  %s2204_s11 = smov 126  }
  0x4f   : > { %v306_v26 = vld [vmem:[%s2380_s16 + $0x38] sm:$0xff]  ;;  %283 = vst.msk [vmem:[#allocation2 + $0xb] sm:$0xff] %vm281_vm1, %v2201_v38  ;;  %s1852_s15 = sld [smem:[#allocation5 + $0x6]]  ;;  %s2205_s23 = smov 124  }
  0x50   : > { %v319_v22 = vmax.f32 %v315_v15, %v311_v11  ;;  %v321_v24 = vadd.f32 %v317_v19, %v311_v11  ;;  %v316_v27 = vmax.f32 %v308_v20, %v310_v21  ;;  %v318_v28 = vadd.f32 %v310_v21, %v308_v20  ;;  %288 = vst.msk [vmem:[#allocation3 + $0x3] sm:$0xff] %vm281_vm1, %v2201_v38  ;;  %s1850_s14 = sld [smem:[#allocation5 + $0x5]]  ;;  %s2206_s10 = smov 122  }
  0x51   : > { %v314_v32 = vsub.f32 %v298_v25, %v306_v26  ;;  %289 = vst.msk [vmem:[#allocation3 + $0xb] sm:$0xff] %vm281_vm1, %v2201_v38  ;;  %v363_v40 = vstv %s1842_s21  ;;  %s1856_s0 = sld [smem:[#allocation5 + $0x8]]  ;;  %s2207_s12 = smov 123  }
  0x52   : > { %v323_v29 = vmax.f32 %v319_v22, %v313_v14  ;;  %v325_v30 = vadd.f32 %v321_v24, %v313_v14  ;;  %v322_v31 = vadd.f32 %v318_v28, %v312_v23  ;;  %v320_v33 = vmax.f32 %v316_v27, %v312_v23  ;;  %276 = vst.msk [vmem:[#allocation2] sm:$0x7] %vm275_vm2, %v2201_v38  ;;  %s1860_s9 = sld [smem:[#allocation5 + $0xa]] }
  0x53   : > { %277 = vst.msk [vmem:[#allocation2 + $0x13] sm:$0x7] %vm275_vm2, %v2201_v38  ;;  %v419_v45 = vstv %s1846_s6  ;;  %v391_v46 = vstv %s1844_s7  ;;  %s1858_s30 = sld [smem:[#allocation5 + $0x9]] }
  0x54   : > { %331 = vrot.lane.b32.xlu0 %v323_v29, %s2200_s27  ;;  %v327_v34 = vmul.f32 0.25, %v325_v30  ;;  %v326_v35 = vadd.f32 %v322_v31, %v314_v32  ;;  %v324_v36 = vmax.f32 %v320_v33, %v314_v32  ;;  %284 = vst.msk [vmem:[#allocation3] sm:$0x7] %vm275_vm2, %v2201_v38  ;;  %v447_v50 = vstv %s1848_s26  ;;  %s1866_s21 = sld [smem:[#allocation5 + $0xd]] }
  0x55   : > { %285 = vst.msk [vmem:[#allocation3 + $0x13] sm:$0x7] %vm275_vm2, %v2201_v38  ;;  %v503_v55 = vstv %s1852_s15  ;;  %s1864_s6 = sld [smem:[#allocation5 + $0xc]] }
  0x56   : > { %342 = vrot.lane.b32.xlu1 %v327_v34, %s2200_s27  ;;  %v328_v37 = vmul.f32 0.25, %v326_v35  ;;  %v475_v56 = vstv %s1850_s14  ;;  %s1870_s7 = sld [smem:[#allocation5 + $0xf]] }
  0x57   : > { %v543_v62 = vstv %s1856_s0  ;;  %s1843_s26 = sld [smem:[#allocation5 + $0x32]] }
  0x58   : > { %v599_v3 = vstv %s1860_s9  ;;  %s1845_s15 = sld [smem:[#allocation5 + $0x33]] }
  0x59   : > { %v571_v4 = vstv %s1858_s30  ;;  %s1847_s14 = sld [smem:[#allocation5 + $0x34]] }
  0x5a   : > { %v683_v12 = vstv %s1866_s21  ;;  %s1849_s0 = sld [smem:[#allocation5 + $0x35]] }
  0x5b   : > { %v655_v13 = vstv %s1864_s6  ;;  %s1851_s9 = sld [smem:[#allocation5 + $0x36]] }
  0x5c   : > { %333 = vrot.lane.b32.xlu0 %v324_v36, %s2200_s27  ;;  %v723_v18 = vstv %s1870_s7  ;;  %s1853_s30 = sld [smem:[#allocation5 + $0x37]] }
  0x5d   : > { %v377_v23 = vstv %s1843_s26  ;;  %s1859_s21 = sld [smem:[#allocation5 + $0x3a]] }
  0x5e   : > { %344 = vrot.lane.b32.xlu1 %v328_v37, %s2200_s27  ;;  %s1862_s27 = sld [smem:[#allocation5 + $0xb]]  ;;  %v405_v29 = vstv %s1845_s15 }
  0x5f   : > { %v433_v30 = vstv %s1847_s14  ;;  %s1861_s6 = sld [smem:[#allocation5 + $0x3b]] }
  0x60   : > { %v461_v34 = vstv %s1849_s0  ;;  %s1863_s7 = sld [smem:[#allocation5 + $0x3c]] }
  0x61   : > { %s1865_s26 = sld [smem:[#allocation5 + $0x3d]] }
  0x62   : > { %s1867_s15 = sld [smem:[#allocation5 + $0x3e]] }
  0x63   : > { %s1871_s14 = sld [smem:[#allocation5 + $0x40]] }
  0x64   : > { %v627_v8 = vstv %s1862_s27  ;;  %s1857_s27 = sld [smem:[#allocation5 + $0x39]] }
  0x65   : > { %s1873_s0 = sld [smem:[#allocation5 + $0x41]] }
  0xc6   : > { %v332_v39 = vpop.permute.xlu0 %331 }
  0xc7   : > { %338 = vst.msk [vmem:[#allocation2 + $0x3] sm:$0xff] %vm337_vm3, %v332_v39  ;;  %v489_v39 = vstv %s1851_s9  ;;  %s1872_s9 = sld [smem:[#allocation5 + $0x10]] }
  0xc8   : > { %v343_v54 = vpop.permute.xlu1 %342 }
  0xc9   : > { %348 = vst.msk [vmem:[#allocation3 + $0x3] sm:$0xff] %vm337_vm3, %v343_v54  ;;  %v585_v54 = vstv %s1859_s21  ;;  %s2564_s21 = sld [smem:[#allocation5 + $0x12]] }
  0xce   : > { %v334_v41 = vpop.permute.xlu0 %333  ;;  %v2403_v42 = vld [vmem:[#allocation2] sm:$0xff] }
  0xcf   : > { %339 = vst.msk [vmem:[#allocation2 + $0xb] sm:$0xff] %vm337_vm3, %v334_v41  ;;  %v364_v43 = vmul.f32 %v363_v40, %v2403_v42  ;;  %v448_v51 = vmul.f32 %v447_v50, %v2403_v42  ;;  %v420_v52 = vmul.f32 %v419_v45, %v2403_v42  ;;  %v392_v53 = vmul.f32 %v391_v46, %v2403_v42  ;;  %v2430_v61 = vld [vmem:[#allocation2 + $0x1] sm:$0xff] }
  0xd0   : > { %v345_v60 = vpop.permute.xlu1 %344  ;;  %v544_v63 = vmul.f32 %v543_v62, %v2430_v61  ;;  %v504_v0 = vmul.f32 %v503_v55, %v2403_v42  ;;  %v476_v1 = vmul.f32 %v475_v56, %v2403_v42  ;;  %v628_v9 = vmul.f32 %v627_v8, %v2430_v61  ;;  %v2458_v17 = vld [vmem:[#allocation2 + $0x2] sm:$0xff]  ;;  %v2468_v24 = vld [vmem:[#allocation3] sm:$0xff] }
  0xd1   : > { %368 = vrot.lane.b32.xlu2 %v364_v43, %s2202_s13  ;;  %349 = vst.msk [vmem:[#allocation3 + $0xb] sm:$0xff] %vm337_vm3, %v345_v60  ;;  %v600_v10 = vmul.f32 %v599_v3, %v2430_v61  ;;  %v572_v11 = vmul.f32 %v571_v4, %v2430_v61  ;;  %v724_v19 = vmul.f32 %v723_v18, %v2458_v17  ;;  %v641_v60 = vstv %s1863_s7  ;;  %s2572_s7 = sld [smem:[#allocation5 + $0xe]] }
  0xd2   : > { %v684_v20 = vmul.f32 %v683_v12, %v2430_v61  ;;  %v656_v21 = vmul.f32 %v655_v13, %v2430_v61  ;;  %v378_v26 = vmul.f32 %v377_v23, %v2468_v24  ;;  %v406_v31 = vmul.f32 %v405_v29, %v2468_v24 }
  0xd3   : > { %v462_v36 = vmul.f32 %v461_v34, %v2468_v24  ;;  %v434_v37 = vmul.f32 %v433_v30, %v2468_v24  ;;  %v490_v41 = vmul.f32 %v489_v39, %v2468_v24 }
  0xd6   : > { %v2408_v44 = vld [vmem:[#allocation2 + $0x8] sm:$0xff] }
  0xd7   : > { %v365_v47 = vmul.f32 %v363_v40, %v2408_v44  ;;  %v421_v48 = vmul.f32 %v419_v45, %v2408_v44  ;;  %v393_v49 = vmul.f32 %v391_v46, %v2408_v44  ;;  %v505_v57 = vmul.f32 %v503_v55, %v2408_v44  ;;  %v2438_v2 = vld [vmem:[#allocation2 + $0x9] sm:$0xff] }
  0xd8   : > { %v477_v58 = vmul.f32 %v475_v56, %v2408_v44  ;;  %v449_v59 = vmul.f32 %v447_v50, %v2408_v44  ;;  %v601_v5 = vmul.f32 %v599_v3, %v2438_v2  ;;  %v573_v6 = vmul.f32 %v571_v4, %v2438_v2  ;;  %v2466_v22 = vld [vmem:[#allocation3 + $0x8] sm:$0xff]  ;;  %v2472_v27 = vld [vmem:[#allocation2 + $0xa] sm:$0xff] }
  0xd9   : > { %426 = vrot.lane.b32.xlu1 %v421_v48, %s2203_s5  ;;  %398 = vrot.lane.b32.xlu0 %v393_v49, %s2204_s11  ;;  %v545_v7 = vmul.f32 %v543_v62, %v2438_v2  ;;  %v685_v14 = vmul.f32 %v683_v12, %v2438_v2  ;;  %v657_v15 = vmul.f32 %v655_v13, %v2438_v2  ;;  %v517_v40 = vstv %s1853_s30  ;;  %v2502_v49 = vld [vmem:[#allocation3 + $0x1] sm:$0xff]  ;;  %v2542_v13 = vld [vmem:[#allocation3 + $0xa] sm:$0xff]  ;;  %s1874_s30 = sld [smem:[#allocation5 + $0x11]] }
  0xda   : > { %370 = vrot.lane.b32.xlu2 %v365_v47, %s2202_s13  ;;  %v629_v16 = vmul.f32 %v627_v8, %v2438_v2  ;;  %v379_v25 = vmul.f32 %v377_v23, %v2466_v22  ;;  %v725_v28 = vmul.f32 %v723_v18, %v2472_v27  ;;  %v435_v32 = vmul.f32 %v433_v30, %v2466_v22  ;;  %v2500_v47 = vld [vmem:[#allocation3 + $0x9] sm:$0xff] }
  0xdb   : > { %v407_v33 = vmul.f32 %v405_v29, %v2466_v22  ;;  %v463_v35 = vmul.f32 %v461_v34, %v2466_v22  ;;  %v519_v43 = vmul.f32 %v517_v40, %v2466_v22  ;;  %v491_v45 = vmul.f32 %v489_v39, %v2466_v22 }
  0xdc   : > { %v557_v48 = vstv %s1857_s27  ;;  %v613_v55 = vstv %s1861_s6  ;;  %v586_v56 = vmul.f32 %v585_v54, %v2502_v49  ;;  %v643_v62 = vmul.f32 %v641_v60, %v2500_v47  ;;  %s1854_s27 = sld [smem:[#allocation5 + $0x7]] }
  0xdd   : > { %v559_v50 = vmul.f32 %v557_v48, %v2500_v47  ;;  %s1875_s6 = sld [smem:[#allocation5 + $0x42]] }
  0xdf   : > { %v779_v34 = vstv %s1874_s30  ;;  %s2605_s30 = sld [smem:[#allocation5 + $0x16]] }
  0xe1   : > { %452 = vrot.lane.b32.xlu1 %v448_v51, %s2205_s23  ;;  %424 = vrot.lane.b32.xlu0 %v420_v52, %s2203_s5  ;;  %v558_v51 = vmul.f32 %v557_v48, %v2502_v49  ;;  %v518_v52 = vmul.f32 %v517_v40, %v2468_v24  ;;  %v807_v48 = vstv %s2564_s21  ;;  %s2614_s21 = sld [smem:[#allocation5]] }
  0xe2   : > { %396 = vrot.lane.b32.xlu2 %v392_v53, %s2204_s11  ;;  %v535_v39 = vstv %s1854_s27  ;;  %s1881_s27 = sld [smem:[#allocation5 + $0x45]] }
  0xe9   : > { %510 = vrot.lane.b32.xlu1 %v505_v57, %s2206_s10  ;;  %482 = vrot.lane.b32.xlu0 %v477_v58, %s2207_s12  ;;  %v615_v57 = vmul.f32 %v613_v55, %v2500_v47  ;;  %v587_v58 = vmul.f32 %v585_v54, %v2500_v47  ;;  %v808_v54 = vmul.f32 %v807_v48, %v2458_v17 }
  0xea   : > { %454 = vrot.lane.b32.xlu2 %v449_v59, %s2205_s23 }
  0xf1   : > { %548 = vrot.lane.b32.xlu1 %v544_v63, %s2202_s13  ;;  %508 = vrot.lane.b32.xlu0 %v504_v0, %s2206_s10  ;;  %v642_v63 = vmul.f32 %v641_v60, %v2502_v49  ;;  %v614_v0 = vmul.f32 %v613_v55, %v2502_v49  ;;  %v715_v60 = vstv %s2572_s7  ;;  %s2637_s7 = sld [smem:[#allocation5 + $0x48]] }
  0xf2   : > { %480 = vrot.lane.b32.xlu2 %v476_v1, %s2207_s12 }
  0xf9   : > { %606 = vrot.lane.b32.xlu1 %v601_v5, %s2203_s5  ;;  %578 = vrot.lane.b32.xlu0 %v573_v6, %s2204_s11  ;;  %v669_v5 = vstv %s1865_s26  ;;  %v697_v6 = vstv %s1867_s15  ;;  %s1877_s26 = sld [smem:[#allocation5 + $0x43]] }
  0xfa   : > { %550 = vrot.lane.b32.xlu2 %v545_v7, %s2202_s13  ;;  %v670_v7 = vmul.f32 %v669_v5, %v2502_v49  ;;  %v699_v8 = vmul.f32 %v697_v6, %v2500_v47  ;;  %s2585_s15 = sld [smem:[#allocation5 + $0x44]] }
 0x101   : > { %632 = vrot.lane.b32.xlu1 %v628_v9, %s2205_s23  ;;  %604 = vrot.lane.b32.xlu0 %v600_v10, %s2203_s5  ;;  %v671_v9 = vmul.f32 %v669_v5, %v2500_v47 }
 0x102   : > { %576 = vrot.lane.b32.xlu2 %v572_v11, %s2204_s11 }
 0x109   : > { %690 = vrot.lane.b32.xlu1 %v685_v14, %s2206_s10  ;;  %662 = vrot.lane.b32.xlu0 %v657_v15, %s2207_s12  ;;  %v737_v14 = vstv %s1871_s14  ;;  %v2544_v15 = vld [vmem:[#allocation3 + $0x2] sm:$0xff]  ;;  %s1878_s14 = sld [smem:[#allocation5 + $0x13]] }
 0x10a   : > { %634 = vrot.lane.b32.xlu2 %v629_v16, %s2205_s23  ;;  %v739_v16 = vmul.f32 %v737_v14, %v2542_v13  ;;  %v738_v18 = vmul.f32 %v737_v14, %v2544_v15 }
 0x111   : > { %728 = vrot.lane.b32.xlu1 %v724_v19, %s2202_s13  ;;  %688 = vrot.lane.b32.xlu0 %v684_v20, %s2206_s10  ;;  %v698_v19 = vmul.f32 %v697_v6, %v2502_v49  ;;  %v821_v6 = vstv %s1877_s26  ;;  %s1886_s26 = sld [smem:[#allocation5 + $0x17]] }
 0x112   : > { %660 = vrot.lane.b32.xlu2 %v656_v21, %s2207_s12  ;;  %v822_v14 = vmul.f32 %v821_v6, %v2544_v15 }
 0x119   : > { %384 = vrot.lane.b32.xlu1 %v379_v25, %s2202_s13  ;;  %382 = vrot.lane.b32.xlu0 %v378_v26, %s2202_s13  ;;  %v765_v25 = vstv %s1873_s0  ;;  %v751_v26 = vstv %s1872_s9  ;;  %s1880_s0 = sld [smem:[#allocation5 + $0x14]] }
 0x11a   : > { %730 = vrot.lane.b32.xlu2 %v725_v28, %s2202_s13  ;;  %v766_v28 = vmul.f32 %v765_v25, %v2544_v15  ;;  %v753_v29 = vmul.f32 %v751_v26, %v2472_v27  ;;  %v752_v30 = vmul.f32 %v751_v26, %v2458_v17  ;;  %s1841_s9 = sld [smem:[#allocation5 + $0x31]] }
 0x121   : > { %410 = vrot.lane.b32.xlu1 %v406_v31, %s2204_s11  ;;  %440 = vrot.lane.b32.xlu0 %v435_v32, %s2203_s5 }
 0x122   : > { %412 = vrot.lane.b32.xlu2 %v407_v33, %s2204_s11 }
 0x129   : > { %468 = vrot.lane.b32.xlu1 %v463_v35, %s2205_s23  ;;  %466 = vrot.lane.b32.xlu0 %v462_v36, %s2205_s23  ;;  %v781_v35 = vmul.f32 %v779_v34, %v2472_v27  ;;  %v780_v36 = vmul.f32 %v779_v34, %v2458_v17 }
 0x12a   : > { %438 = vrot.lane.b32.xlu2 %v434_v37, %s2203_s5  ;;  %v767_v37 = vmul.f32 %v765_v25, %v2542_v13 }
 0x12b   : > { %v2490_v38 = vpop.permute.xlu2 %368 }
 0x131   : > { %494 = vrot.lane.b32.xlu1 %v490_v41, %s2207_s12  ;;  %524 = vrot.lane.b32.xlu0 %v519_v43, %s2206_s10  ;;  %v536_v43 = vmul.f32 %v535_v39, %v2430_v61 }
 0x132   : > { %496 = vrot.lane.b32.xlu2 %v491_v45, %s2207_s12 }
 0x134   : > { %v2498_v46 = vpop.permute.xlu2 %370 }
 0x139   : > { %564 = vrot.lane.b32.xlu1 %v559_v50, %s2202_s13  ;;  %562 = vrot.lane.b32.xlu0 %v558_v51, %s2202_s13  ;;  %v793_v50 = vstv %s1875_s6  ;;  %v537_v51 = vmul.f32 %v535_v39, %v2438_v2  ;;  %v717_v2 = vmul.f32 %v715_v60, %v2472_v27  ;;  %s1885_s6 = sld [smem:[#allocation5 + $0x47]] }
 0x13a   : > { %522 = vrot.lane.b32.xlu2 %v518_v52, %s2206_s10  ;;  %v795_v55 = vmul.f32 %v793_v50, %v2542_v13 }
 0x13c   : > { %v2510_v53 = vpop.permute.xlu2 %396 }
 0x141   : > { %590 = vrot.lane.b32.xlu1 %v586_v56, %s2204_s11  ;;  %620 = vrot.lane.b32.xlu0 %v615_v57, %s2203_s5  ;;  %v794_v57 = vmul.f32 %v793_v50, %v2544_v15 }
 0x142   : > { %592 = vrot.lane.b32.xlu2 %v587_v58, %s2204_s11 }
 0x144   : > { %v2518_v59 = vpop.permute.xlu2 %454 }
 0x149   : > { %648 = vrot.lane.b32.xlu1 %v643_v62, %s2205_s23  ;;  %646 = vrot.lane.b32.xlu0 %v642_v63, %s2205_s23 }
 0x14a   : > { %618 = vrot.lane.b32.xlu2 %v614_v0, %s2203_s5 }
 0x14b   : > { %v2526_v1 = vpop.permute.xlu1 %426  ;;  %v2528_v3 = vpop.permute.xlu0 %398 }
 0x14c   : > { %v2530_v4 = vpop.permute.xlu2 %480 }
 0x151   : > { %674 = vrot.lane.b32.xlu1 %v670_v7, %s2207_s12  ;;  %704 = vrot.lane.b32.xlu0 %v699_v8, %s2206_s10 }
 0x152   : > { %676 = vrot.lane.b32.xlu2 %v671_v9, %s2207_s12 }
 0x153   : > { %v2538_v10 = vpop.permute.xlu1 %452  ;;  %v2540_v11 = vpop.permute.xlu0 %424 }
 0x154   : > { %v551_v12 = vpop.permute.xlu2 %550 }
 0x155   : > { %v555_v56 = vadd.f32 %v551_v12, %v537_v51  ;;  %v823_v12 = vmul.f32 %v821_v6, %v2542_v13  ;;  %v359_v51 = vstv %s1841_s9  ;;  %s1889_s9 = sld [smem:[#allocation5 + $0x49]] }
 0x159   : > { %744 = vrot.lane.b32.xlu1 %v739_v16, %s2202_s13  ;;  %742 = vrot.lane.b32.xlu0 %v738_v18, %s2202_s13  ;;  %v809_v16 = vmul.f32 %v807_v48, %v2472_v27 }
 0x15a   : > { %702 = vrot.lane.b32.xlu2 %v698_v19, %s2206_s10 }
 0x15b   : > { %v2552_v20 = vpop.permute.xlu1 %510  ;;  %v2554_v21 = vpop.permute.xlu0 %482 }
 0x15c   : > { %v577_v23 = vpop.permute.xlu2 %576 }
 0x161   : > { %770 = vrot.lane.b32.xlu1 %v766_v28, %s2204_s11  ;;  %758 = vrot.lane.b32.xlu0 %v753_v29, %s2204_s11  ;;  %v849_v29 = vstv %s2585_s15  ;;  %s2652_s15 = sld [smem:[#allocation5 + $0x18]] }
 0x162   : > { %756 = vrot.lane.b32.xlu2 %v752_v30, %s2204_s11  ;;  %v835_v30 = vstv %s1878_s14  ;;  %v850_v34 = vmul.f32 %v849_v29, %v2544_v15  ;;  %s1855_s14 = sld [smem:[#allocation5 + $0x38]] }
 0x163   : > { %v549_v31 = vpop.permute.xlu1 %548  ;;  %v2562_v32 = vpop.permute.xlu0 %508 }
 0x164   : > { %v635_v33 = vpop.permute.xlu2 %634  ;;  %v554_v52 = vadd.f32 %v549_v31, %v536_v43 }
 0x166   : > { %v582_v58 = vadd.f32 %v577_v23, %v554_v52  ;;  %v851_v52 = vmul.f32 %v849_v29, %v2542_v13 }
 0x169   : > { %786 = vrot.lane.b32.xlu1 %v781_v35, %s2203_s5  ;;  %784 = vrot.lane.b32.xlu0 %v780_v36, %s2203_s5  ;;  %v837_v35 = vmul.f32 %v835_v30, %v2472_v27  ;;  %v836_v36 = vmul.f32 %v835_v30, %v2458_v17 }
 0x16a   : > { %772 = vrot.lane.b32.xlu2 %v767_v37, %s2204_s11 }
 0x16b   : > { %v607_v40 = vpop.permute.xlu1 %606  ;;  %v579_v41 = vpop.permute.xlu0 %578 }
 0x16c   : > { %v661_v45 = vpop.permute.xlu2 %660  ;;  %v583_v61 = vadd.f32 %v579_v41, %v555_v56 }
 0x16e   : > { %v611_v8 = vadd.f32 %v607_v40, %v583_v61 }
 0x170   : > { %v639_v19 = vadd.f32 %v635_v33, %v611_v8  ;;  %v716_v33 = vmul.f32 %v715_v60, %v2458_v17  ;;  %v903_v60 = vstv %s2605_s30  ;;  %s1891_s30 = sld [smem:[#allocation5 + $0x4a]] }
 0x171   : > { %812 = vrot.lane.b32.xlu1 %v808_v54, %s2205_s23  ;;  %800 = vrot.lane.b32.xlu0 %v795_v55, %s2203_s5  ;;  %v361_v54 = vmul.f32 %v359_v51, %v2466_v22  ;;  %v360_v55 = vmul.f32 %v359_v51, %v2468_v24  ;;  %v355_v22 = vstv %s2614_s21  ;;  %s1892_s21 = sld [smem:[#allocation5 + $0x1a]] }
 0x172   : > { %798 = vrot.lane.b32.xlu2 %v794_v57, %s2203_s5  ;;  %v357_v24 = vmul.f32 %v355_v22, %v2408_v44  ;;  %v356_v44 = vmul.f32 %v355_v22, %v2403_v42 }
 0x173   : > { %v633_v62 = vpop.permute.xlu1 %632  ;;  %v605_v63 = vpop.permute.xlu0 %604 }
 0x174   : > { %v610_v0 = vadd.f32 %v605_v63, %v582_v58  ;;  %v731_v5 = vpop.permute.xlu2 %730  ;;  %v2621_v58 = vld [vmem:[#allocation2 + $0x3] sm:$0xff]  ;;  %v374_v30 = vadd.f32 %v2490_v38, %v356_v44 }
 0x175   : > { %v2587_v7 = vadd.f32 %v731_v5, %v717_v2  ;;  %v904_v2 = vmul.f32 %v903_v60, %v2621_v58 }
 0x176   : > { %v638_v9 = vadd.f32 %v633_v62, %v610_v0  ;;  %v877_v62 = vstv %s1881_s27  ;;  %s2690_s27 = sld [smem:[#allocation5 + $0x4b]] }
 0x177   : > { %v879_v0 = vmul.f32 %v877_v62, %v2542_v13  ;;  %v878_v5 = vmul.f32 %v877_v62, %v2544_v15 }
 0x178   : > { %v666_v18 = vadd.f32 %v661_v45, %v638_v9  ;;  %v863_v45 = vstv %s1880_s0  ;;  %v375_v9 = vadd.f32 %v2498_v46, %v357_v24  ;;  %s2668_s0 = sld [smem:[#allocation5 + $0x19]] }
 0x179   : > { %828 = vrot.lane.b32.xlu1 %v823_v12, %s2205_s23  ;;  %826 = vrot.lane.b32.xlu0 %v822_v14, %s2205_s23  ;;  %v865_v48 = vmul.f32 %v863_v45, %v2472_v27  ;;  %v864_v50 = vmul.f32 %v863_v45, %v2458_v17  ;;  %v931_v45 = vstv %s1886_s26  ;;  %s2708_s26 = sld [smem:[#allocation5 + $0x1d]] }
 0x17a   : > { %814 = vrot.lane.b32.xlu2 %v809_v16, %s2205_s23 }
 0x17b   : > { %v691_v23 = vpop.permute.xlu1 %690  ;;  %v663_v25 = vpop.permute.xlu0 %662 }
 0x17c   : > { %v667_v26 = vadd.f32 %v663_v25, %v639_v19  ;;  %v413_v28 = vpop.permute.xlu2 %412  ;;  %v917_v19 = vstv %s1885_s6  ;;  %v2639_v25 = vld [vmem:[#allocation2 + $0xb] sm:$0xff]  ;;  %s1894_s6 = sld [smem:[#allocation5 + $0x1b]] }
 0x17e   : > { %v2596_v31 = vadd.f32 %v691_v23, %v667_v26  ;;  %v2635_v23 = vld [vmem:[#allocation3 + $0x3] sm:$0xff]  ;;  %v403_v26 = vadd.f32 %v2528_v3, %v375_v9  ;;  %v987_v9 = vstv %s2668_s0  ;;  %s1900_s0 = sld [smem:[#allocation5 + $0x1e]] }
 0x17f   : > { %v918_v29 = vmul.f32 %v917_v19, %v2635_v23 }
 0x180   : > { %v431_v42 = vadd.f32 %v2526_v1, %v403_v26  ;;  %v933_v1 = vmul.f32 %v931_v45, %v2639_v25 }
 0x181   : > { %854 = vrot.lane.b32.xlu1 %v850_v34, %s2207_s12  ;;  %842 = vrot.lane.b32.xlu0 %v837_v35, %s2207_s12  ;;  %v905_v34 = vmul.f32 %v903_v60, %v2639_v25  ;;  %v402_v35 = vadd.f32 %v2510_v53, %v374_v30 }
 0x182   : > { %840 = vrot.lane.b32.xlu2 %v836_v36, %s2207_s12 }
 0x183   : > { %v729_v37 = vpop.permute.xlu1 %728  ;;  %v689_v39 = vpop.permute.xlu0 %688 }
 0x184   : > { %v2607_v40 = vadd.f32 %v729_v37, %v716_v33  ;;  %v2609_v41 = vadd.f32 %v689_v39, %v666_v18  ;;  %v439_v43 = vpop.permute.xlu2 %438  ;;  %v2633_v18 = vld [vmem:[#allocation3 + $0xb] sm:$0xff]  ;;  %v430_v33 = vadd.f32 %v2540_v11, %v402_v35  ;;  %v932_v11 = vmul.f32 %v931_v45, %v2621_v58 }
 0x185   : > { %v919_v46 = vmul.f32 %v917_v19, %v2633_v18  ;;  %v1015_v45 = vstv %s1892_s21  ;;  %s1903_s21 = sld [smem:[#allocation5 + $0x50]] }
 0x186   : > { %v458_v51 = vadd.f32 %v2538_v10, %v430_v33 }
 0x189   : > { %870 = vrot.lane.b32.xlu1 %v865_v48, %s2206_s10  ;;  %868 = vrot.lane.b32.xlu0 %v864_v50, %s2206_s10  ;;  %v459_v48 = vadd.f32 %v2518_v59, %v431_v42  ;;  %v989_v42 = vmul.f32 %v987_v9, %v2639_v25 }
 0x18a   : > { %856 = vrot.lane.b32.xlu2 %v851_v52, %s2207_s12 }
 0x18b   : > { %v385_v27 = vpop.permute.xlu1 %384  ;;  %v383_v56 = vpop.permute.xlu0 %382  ;;  %v487_v52 = vadd.f32 %v2554_v21, %v459_v48 }
 0x18c   : > { %v389_v57 = vadd.f32 %v385_v27, %v361_v54  ;;  %v388_v17 = vadd.f32 %v383_v56, %v360_v55  ;;  %v497_v61 = vpop.permute.xlu2 %496  ;;  %v959_v55 = vstv %s2652_s15  ;;  %v486_v56 = vadd.f32 %v2530_v4, %v458_v51  ;;  %s1895_s15 = sld [smem:[#allocation5 + $0x4c]] }
 0x18d   : > { %v515_v27 = vadd.f32 %v2552_v20, %v487_v52  ;;  %v961_v62 = vmul.f32 %v959_v55, %v2639_v25 }
 0x18e   : > { %v417_v63 = vadd.f32 %v413_v28, %v389_v57  ;;  %v514_v21 = vadd.f32 %v2562_v32, %v486_v56 }
 0x191   : > { %908 = vrot.lane.b32.xlu1 %v904_v2, %s2202_s13  ;;  %884 = vrot.lane.b32.xlu0 %v879_v0, %s2206_s10  ;;  %v539_v2 = vstv %s1855_s14  ;;  %s1899_s14 = sld [smem:[#allocation5 + $0x4e]] }
 0x192   : > { %882 = vrot.lane.b32.xlu2 %v878_v5, %s2206_s10  ;;  %v541_v32 = vmul.f32 %v539_v2, %v2500_v47  ;;  %v540_v0 = vmul.f32 %v539_v2, %v2502_v49 }
 0x193   : > { %v411_v6 = vpop.permute.xlu1 %410  ;;  %v441_v8 = vpop.permute.xlu0 %440 }
 0x194   : > { %v416_v12 = vadd.f32 %v411_v6, %v388_v17  ;;  %v445_v14 = vadd.f32 %v441_v8, %v417_v63  ;;  %v523_v16 = vpop.permute.xlu2 %522  ;;  %v960_v63 = vmul.f32 %v959_v55, %v2621_v58 }
 0x196   : > { %v444_v28 = vadd.f32 %v439_v43, %v416_v12  ;;  %v945_v43 = vstv %s2637_s7  ;;  %v973_v12 = vstv %s1889_s9  ;;  %s1869_s7 = sld [smem:[#allocation5 + $0x3f]] }
 0x197   : > { %v946_v53 = vmul.f32 %v945_v43, %v2635_v23  ;;  %v947_v4 = vmul.f32 %v945_v43, %v2633_v18  ;;  %v975_v19 = vmul.f32 %v973_v12, %v2633_v18  ;;  %v974_v44 = vmul.f32 %v973_v12, %v2635_v23  ;;  %s2740_s9 = sld [smem:[#allocation5 + $0x4f]] }
 0x199   : > { %924 = vrot.lane.b32.xlu1 %v919_v46, %s2202_s13  ;;  %922 = vrot.lane.b32.xlu0 %v918_v29, %s2202_s13  ;;  %v1001_v29 = vstv %s1891_s30  ;;  %s1902_s30 = sld [smem:[#allocation5 + $0x1f]] }
 0x19a   : > { %910 = vrot.lane.b32.xlu2 %v905_v34, %s2202_s13  ;;  %v1003_v34 = vmul.f32 %v1001_v29, %v2633_v18  ;;  %v1002_v35 = vmul.f32 %v1001_v29, %v2635_v23 }
 0x19b   : > { %v469_v3 = vpop.permute.xlu1 %468  ;;  %v467_v36 = vpop.permute.xlu0 %466 }
 0x19c   : > { %v473_v37 = vadd.f32 %v469_v3, %v445_v14  ;;  %v472_v38 = vadd.f32 %v467_v36, %v444_v28  ;;  %v593_v39 = vpop.permute.xlu2 %592 }
 0x19e   : > { %v501_v50 = vadd.f32 %v497_v61, %v473_v37 }
 0x1a1   : > { %950 = vrot.lane.b32.xlu1 %v946_v53, %s2204_s11  ;;  %938 = vrot.lane.b32.xlu0 %v933_v1, %s2204_s11  ;;  %v1017_v53 = vmul.f32 %v1015_v45, %v2639_v25  ;;  %v1016_v1 = vmul.f32 %v1015_v45, %v2621_v58 }
 0x1a2   : > { %936 = vrot.lane.b32.xlu2 %v932_v11, %s2204_s11 }
 0x1a3   : > { %v495_v54 = vpop.permute.xlu1 %494  ;;  %v525_v59 = vpop.permute.xlu0 %524 }
 0x1a4   : > { %v500_v57 = vadd.f32 %v495_v54, %v472_v38  ;;  %v529_v17 = vadd.f32 %v525_v59, %v501_v50  ;;  %v619_v10 = vpop.permute.xlu2 %618  ;;  %v1043_v59 = vstv %s1894_s6  ;;  %s2766_s6 = sld [smem:[#allocation5 + $0x15]] }
 0x1a5   : > { %v1045_v56 = vmul.f32 %v1043_v59, %v2639_v25 }
 0x1a6   : > { %v528_v61 = vadd.f32 %v523_v16, %v500_v57  ;;  %v2671_v60 = vadd.f32 %v529_v17, %v515_v27  ;;  %v988_v16 = vmul.f32 %v987_v9, %v2621_v58  ;;  %v1044_v57 = vmul.f32 %v1043_v59, %v2621_v58 }
 0x1a7   : > { %v719_v17 = vstv %s1869_s7  ;;  %s1905_s7 = sld [smem:[#allocation5 + $0x51]] }
 0x1a8   : > { %v2675_v20 = vadd.f32 %v528_v61, %v514_v21 }
 0x1a9   : > { %966 = vrot.lane.b32.xlu1 %v961_v62, %s2203_s5  ;;  %964 = vrot.lane.b32.xlu0 %v960_v63, %s2203_s5  ;;  %v720_v63 = vmul.f32 %v719_v17, %v2544_v15 }
 0x1aa   : > { %952 = vrot.lane.b32.xlu2 %v947_v4, %s2204_s11 }
 0x1ab   : > { %v565_v5 = vpop.permute.xlu1 %564  ;;  %v563_v22 = vpop.permute.xlu0 %562 }
 0x1ac   : > { %v569_v24 = vadd.f32 %v565_v5, %v541_v32  ;;  %v568_v6 = vadd.f32 %v563_v22, %v540_v0  ;;  %v677_v8 = vpop.permute.xlu2 %676  ;;  %v2726_v0 = vld [vmem:[#allocation2 + $0x4] sm:$0xff]  ;;  %v1083_v5 = vstv %s2708_s26  ;;  %v1057_v22 = vstv %s1895_s15  ;;  %s1906_s26 = sld [smem:[#allocation5 + $0x21]] }
 0x1ad   : > { %s2777_s15 = sld [smem:[#allocation5 + $0x52]] }
 0x1ae   : > { %v597_v14 = vadd.f32 %v593_v39, %v569_v24  ;;  %v1029_v39 = vstv %s2690_s27  ;;  %s2758_s27 = sld [smem:[#allocation5 + $0x20]] }
 0x1af   : > { %v1030_v50 = vmul.f32 %v1029_v39, %v2635_v23  ;;  %v1031_v61 = vmul.f32 %v1029_v39, %v2633_v18 }
 0x1b1   : > { %992 = vrot.lane.b32.xlu1 %v988_v16, %s2205_s23  ;;  %980 = vrot.lane.b32.xlu0 %v975_v19, %s2203_s5  ;;  %v2736_v16 = vld [vmem:[#allocation3 + $0xc] sm:$0xff]  ;;  %v1097_v19 = vstv %s1899_s14  ;;  %s1908_s14 = sld [smem:[#allocation5 + $0x22]] }
 0x1b2   : > { %978 = vrot.lane.b32.xlu2 %v974_v44, %s2203_s5  ;;  %v2738_v44 = vld [vmem:[#allocation3 + $0x4] sm:$0xff] }
 0x1b3   : > { %v591_v47 = vpop.permute.xlu1 %590  ;;  %v621_v49 = vpop.permute.xlu0 %620 }
 0x1b4   : > { %v596_v26 = vadd.f32 %v591_v47, %v568_v6  ;;  %v625_v28 = vadd.f32 %v621_v49, %v597_v14  ;;  %v703_v46 = vpop.permute.xlu2 %702  ;;  %v1059_v6 = vmul.f32 %v1057_v22, %v2633_v18  ;;  %v2742_v47 = vld [vmem:[#allocation2 + $0xc] sm:$0xff] }
 0x1b6   : > { %v624_v30 = vadd.f32 %v619_v10, %v596_v26  ;;  %v1099_v26 = vmul.f32 %v1097_v19, %v2736_v16 }
 0x1b9   : > { %1008 = vrot.lane.b32.xlu1 %v1003_v34, %s2205_s23  ;;  %1006 = vrot.lane.b32.xlu0 %v1002_v35, %s2205_s23 }
 0x1ba   : > { %994 = vrot.lane.b32.xlu2 %v989_v42, %s2205_s23  ;;  %v1125_v42 = vstv %s2740_s9  ;;  %s2797_s9 = sld [smem:[#allocation5 + $0x24]] }
 0x1bb   : > { %v649_v3 = vpop.permute.xlu1 %648  ;;  %v647_v36 = vpop.permute.xlu0 %646 }
 0x1bc   : > { %v653_v33 = vadd.f32 %v649_v3, %v625_v28  ;;  %v652_v37 = vadd.f32 %v647_v36, %v624_v30  ;;  %v757_v38 = vpop.permute.xlu2 %756  ;;  %v1098_v28 = vmul.f32 %v1097_v19, %v2738_v44  ;;  %v1111_v3 = vstv %s1900_s0  ;;  %s1883_s0 = sld [smem:[#allocation5 + $0x46]] }
 0x1bd   : > { %v2700_v43 = vadd.f32 %v757_v38, %v2607_v40  ;;  %v1112_v38 = vmul.f32 %v1111_v3, %v2726_v0  ;;  %v1209_v19 = vstv %s2777_s15  ;;  %s1917_s15 = sld [smem:[#allocation5 + $0x57]] }
 0x1be   : > { %v681_v48 = vadd.f32 %v677_v8, %v653_v33  ;;  %v1058_v8 = vmul.f32 %v1057_v22, %v2635_v23  ;;  %v1126_v33 = vmul.f32 %v1125_v42, %v2738_v44  ;;  %v1181_v22 = vstv %s1905_s7  ;;  %s1916_s7 = sld [smem:[#allocation5 + $0x26]] }
 0x1c1   : > { %1034 = vrot.lane.b32.xlu1 %v1030_v50, %s2207_s12  ;;  %1022 = vrot.lane.b32.xlu0 %v1017_v53, %s2207_s12  ;;  %v1139_v53 = vstv %s1902_s30  ;;  %s1909_s30 = sld [smem:[#allocation5 + $0x53]] }
 0x1c2   : > { %1020 = vrot.lane.b32.xlu2 %v1016_v1, %s2207_s12 }
 0x1c3   : > { %v675_v51 = vpop.permute.xlu1 %674  ;;  %v705_v52 = vpop.permute.xlu0 %704 }
 0x1c4   : > { %v680_v11 = vadd.f32 %v675_v51, %v652_v37  ;;  %v709_v40 = vadd.f32 %v705_v52, %v681_v48  ;;  %v773_v54 = vpop.permute.xlu2 %772  ;;  %v1113_v37 = vmul.f32 %v1111_v3, %v2742_v47  ;;  %v1141_v51 = vmul.f32 %v1139_v53, %v2742_v47 }
 0x1c5   : > { %v1140_v52 = vmul.f32 %v1139_v53, %v2726_v0 }
 0x1c6   : > { %v708_v55 = vadd.f32 %v703_v46, %v680_v11  ;;  %v1613_v27 = vadd.f32 %v709_v40, %v2596_v31  ;;  %v721_v31 = vmul.f32 %v719_v17, %v2542_v13  ;;  %v1085_v46 = vmul.f32 %v1083_v5, %v2742_v47 }
 0x1c7   : > { %v1127_v11 = vmul.f32 %v1125_v42, %v2736_v16 }
 0x1c8   : > { %v1612_v10 = vadd.f32 %v708_v55, %v2609_v41  ;;  %v2715_v21 = vadd.f32 %v1613_v27, %v2671_v60 }
 0x1c9   : > { %1050 = vrot.lane.b32.xlu1 %v1045_v56, %s2206_s10  ;;  %1048 = vrot.lane.b32.xlu0 %v1044_v57, %s2206_s10  ;;  %v1167_v56 = vstv %s2758_s27  ;;  %v1153_v57 = vstv %s1903_s21  ;;  %s1913_s27 = sld [smem:[#allocation5 + $0x55]] }
 0x1ca   : > { %v2721_v62 = vadd.f32 %v1612_v10, %v2675_v20  ;;  %1036 = vrot.lane.b32.xlu2 %v1031_v61, %s2207_s12  ;;  %v1084_v20 = vmul.f32 %v1083_v5, %v2726_v0  ;;  %v1168_v10 = vmul.f32 %v1167_v56, %v2726_v0  ;;  %v1155_v61 = vmul.f32 %v1153_v57, %v2736_v16  ;;  %s1914_s21 = sld [smem:[#allocation5 + $0x25]] }
 0x1cb   : > { %v745_v2 = vpop.permute.xlu1 %744  ;;  %v743_v41 = vpop.permute.xlu0 %742 }
 0x1cc   : > { %v749_v4 = vadd.f32 %v745_v2, %v721_v31  ;;  %v748_v60 = vadd.f32 %v743_v41, %v720_v63  ;;  %v799_v32 = vpop.permute.xlu2 %798  ;;  %v1154_v31 = vmul.f32 %v1153_v57, %v2738_v44  ;;  %v895_v63 = vstv %s2766_s6  ;;  %s2823_s6 = sld [smem:[#allocation5 + $0x56]] }
 0x1ce   : > { %v777_v24 = vadd.f32 %v773_v54, %v749_v4  ;;  %v897_v4 = vmul.f32 %v895_v63, %v2639_v25 }
 0x1d1   : > { %1088 = vrot.lane.b32.xlu1 %v1084_v20, %s2202_s13  ;;  %1064 = vrot.lane.b32.xlu0 %v1059_v6, %s2206_s10  ;;  %v1183_v6 = vmul.f32 %v1181_v22, %v2736_v16 }
 0x1d2   : > { %1062 = vrot.lane.b32.xlu2 %v1058_v8, %s2206_s10  ;;  %v1182_v8 = vmul.f32 %v1181_v22, %v2738_v44 }
 0x1d3   : > { %v771_v13 = vpop.permute.xlu1 %770  ;;  %v759_v15 = vpop.permute.xlu0 %758 }
 0x1d4   : > { %v776_v9 = vadd.f32 %v771_v13, %v748_v60  ;;  %v763_v12 = vadd.f32 %v759_v15, %v2587_v7  ;;  %v815_v14 = vpop.permute.xlu2 %814  ;;  %v1169_v13 = vmul.f32 %v1167_v56, %v2742_v47 }
 0x1d6   : > { %v804_v49 = vadd.f32 %v799_v32, %v776_v9 }
 0x1d9   : > { %1104 = vrot.lane.b32.xlu1 %v1099_v26, %s2202_s13  ;;  %1102 = vrot.lane.b32.xlu0 %v1098_v28, %s2202_s13  ;;  %v1210_v28 = vmul.f32 %v1209_v19, %v2738_v44 }
 0x1da   : > { %1090 = vrot.lane.b32.xlu2 %v1085_v46, %s2202_s13 }
 0x1db   : > { %v787_v7 = vpop.permute.xlu1 %786  ;;  %v785_v29 = vpop.permute.xlu0 %784 }
 0x1dc   : > { %v791_v30 = vadd.f32 %v787_v7, %v763_v12  ;;  %v790_v34 = vadd.f32 %v785_v29, %v2700_v43  ;;  %v841_v35 = vpop.permute.xlu2 %840  ;;  %v896_v29 = vmul.f32 %v895_v63, %v2621_v58  ;;  %v1211_v58 = vmul.f32 %v1209_v19, %v2736_v16  ;;  %v2821_v63 = vld [vmem:[#allocation3 + $0x5] sm:$0xff] }
 0x1de   : > { %v819_v36 = vadd.f32 %v815_v14, %v791_v30 }
 0x1e1   : > { %1130 = vrot.lane.b32.xlu1 %v1126_v33, %s2204_s11  ;;  %1118 = vrot.lane.b32.xlu0 %v1113_v37, %s2204_s11 }
 0x1e2   : > { %1116 = vrot.lane.b32.xlu2 %v1112_v38, %s2204_s11 }
 0x1e3   : > { %v813_v39 = vpop.permute.xlu1 %812  ;;  %v801_v45 = vpop.permute.xlu0 %800 }
 0x1e4   : > { %v818_v43 = vadd.f32 %v813_v39, %v790_v34  ;;  %v805_v48 = vadd.f32 %v801_v45, %v777_v24  ;;  %v857_v50 = vpop.permute.xlu2 %856  ;;  %v899_v45 = vstv %s1883_s0  ;;  %s1919_s0 = sld [smem:[#allocation5 + $0x58]] }
 0x1e6   : > { %v846_v1 = vadd.f32 %v841_v35, %v818_v43  ;;  %v901_v43 = vmul.f32 %v899_v45, %v2633_v18 }
 0x1e9   : > { %1146 = vrot.lane.b32.xlu1 %v1141_v51, %s2203_s5  ;;  %1144 = vrot.lane.b32.xlu0 %v1140_v52, %s2203_s5 }
 0x1ea   : > { %1132 = vrot.lane.b32.xlu2 %v1127_v11, %s2204_s11  ;;  %v2809_v11 = vld [vmem:[#allocation2 + $0x5] sm:$0xff] }
 0x1eb   : > { %v829_v40 = vpop.permute.xlu1 %828  ;;  %v827_v54 = vpop.permute.xlu0 %826 }
 0x1ec   : > { %v833_v59 = vadd.f32 %v829_v40, %v805_v48  ;;  %v832_v55 = vadd.f32 %v827_v54, %v804_v49  ;;  %v883_v27 = vpop.permute.xlu2 %882  ;;  %v1195_v49 = vstv %s1906_s26  ;;  %v900_v48 = vmul.f32 %v899_v45, %v2635_v23  ;;  %s2840_s26 = sld [smem:[#allocation5 + $0x27]] }
 0x1ed   : > { %v1197_v46 = vmul.f32 %v1195_v49, %v2742_v47  ;;  %v1196_v7 = vmul.f32 %v1195_v49, %v2726_v0  ;;  %v1263_v40 = vstv %s2797_s9  ;;  %v1237_v54 = vstv %s1909_s30  ;;  %s2859_s9 = sld [smem:[#allocation5 + $0x2b]] }
 0x1ee   : > { %v861_v17 = vadd.f32 %v857_v50, %v833_v59  ;;  %v1238_v56 = vmul.f32 %v1237_v54, %v2738_v44  ;;  %v1333_v45 = vstv %s1917_s15  ;;  %s1920_s30 = sld [smem:[#allocation5 + $0x28]] }
 0x1ef   : > { %s1931_s15 = sld [smem:[#allocation5 + $0x5e]] }
 0x1f1   : > { %1172 = vrot.lane.b32.xlu1 %v1168_v10, %s2205_s23  ;;  %1160 = vrot.lane.b32.xlu0 %v1155_v61, %s2203_s5  ;;  %v2819_v61 = vld [vmem:[#allocation3 + $0xd] sm:$0xff] }
 0x1f2   : > { %1158 = vrot.lane.b32.xlu2 %v1154_v31, %s2203_s5  ;;  %v1277_v31 = vstv %s1913_s27  ;;  %s1927_s27 = sld [smem:[#allocation5 + $0x5c]] }
 0x1f3   : > { %v855_v2 = vpop.permute.xlu1 %854  ;;  %v843_v41 = vpop.permute.xlu0 %842 }
 0x1f4   : > { %v860_v60 = vadd.f32 %v855_v2, %v832_v55  ;;  %v847_v32 = vadd.f32 %v843_v41, %v819_v36  ;;  %v911_v5 = vpop.permute.xlu2 %910  ;;  %v1223_v36 = vstv %s1908_s14  ;;  %v1264_v55 = vmul.f32 %v1263_v40, %v2809_v11  ;;  %v2825_v2 = vld [vmem:[#allocation2 + $0xd] sm:$0xff]  ;;  %s2845_s14 = sld [smem:[#allocation5 + $0x1c]] }
 0x1f5   : > { %v2779_v24 = vadd.f32 %v911_v5, %v897_v4  ;;  %v1225_v38 = vmul.f32 %v1223_v36, %v2742_v47  ;;  %v1224_v39 = vmul.f32 %v1223_v36, %v2726_v0  ;;  %v1279_v4 = vmul.f32 %v1277_v31, %v2819_v61 }
 0x1f6   : > { %v888_v20 = vadd.f32 %v883_v27, %v860_v60  ;;  %v1239_v27 = vmul.f32 %v1237_v54, %v2736_v16  ;;  %v1278_v60 = vmul.f32 %v1277_v31, %v2821_v63 }
 0x1f9   : > { %1188 = vrot.lane.b32.xlu1 %v1183_v6, %s2205_s23  ;;  %1186 = vrot.lane.b32.xlu0 %v1182_v8, %s2205_s23  ;;  %v1305_v8 = vstv %s2823_s6  ;;  %s2885_s6 = sld [smem:[#allocation5 + $0x2c]] }
 0x1fa   : > { %1174 = vrot.lane.b32.xlu2 %v1169_v13, %s2205_s23  ;;  %v1291_v13 = vstv %s1914_s21  ;;  %s2874_s21 = sld [smem:[#allocation5 + $0x4d]] }
 0x1fb   : > { %v871_v25 = vpop.permute.xlu1 %870  ;;  %v869_v15 = vpop.permute.xlu0 %868 }
 0x1fc   : > { %v875_v9 = vadd.f32 %v871_v25, %v847_v32  ;;  %v874_v12 = vadd.f32 %v869_v15, %v846_v1  ;;  %v937_v14 = vpop.permute.xlu2 %936  ;;  %v1265_v32 = vmul.f32 %v1263_v40, %v2825_v2  ;;  %v1306_v15 = vmul.f32 %v1305_v8, %v2821_v63 }
 0x1fe   : > { %v2788_v26 = vadd.f32 %v888_v20, %v874_v12  ;;  %v1292_v12 = vmul.f32 %v1291_v13, %v2809_v11 }
 0x201   : > { %1214 = vrot.lane.b32.xlu1 %v1210_v28, %s2207_s12  ;;  %1202 = vrot.lane.b32.xlu0 %v1197_v46, %s2207_s12 }
 0x202   : > { %1200 = vrot.lane.b32.xlu2 %v1196_v7, %s2207_s12  ;;  %v1319_v7 = vstv %s1916_s7  ;;  %s2891_s7 = sld [smem:[#allocation5 + $0x5d]] }
 0x203   : > { %v909_v30 = vpop.permute.xlu1 %908  ;;  %v885_v34 = vpop.permute.xlu0 %884 }
 0x204   : > { %v914_v35 = vadd.f32 %v909_v30, %v896_v29  ;;  %v889_v42 = vadd.f32 %v885_v34, %v861_v17  ;;  %v953_v3 = vpop.permute.xlu2 %952  ;;  %v1321_v30 = vmul.f32 %v1319_v7, %v2825_v2  ;;  %v1320_v34 = vmul.f32 %v1319_v7, %v2809_v11 }
 0x206   : > { %v2799_v33 = vadd.f32 %v889_v42, %v875_v9  ;;  %v942_v37 = vadd.f32 %v937_v14, %v914_v35  ;;  %v1293_v9 = vmul.f32 %v1291_v13, %v2825_v2  ;;  %v1307_v35 = vmul.f32 %v1305_v8, %v2819_v61 }
 0x209   : > { %1230 = vrot.lane.b32.xlu1 %v1225_v38, %s2206_s10  ;;  %1228 = vrot.lane.b32.xlu0 %v1224_v39, %s2206_s10  ;;  %v1347_v39 = vstv %s2840_s26  ;;  %s1930_s26 = sld [smem:[#allocation5 + $0x2d]] }
 0x20a   : > { %1216 = vrot.lane.b32.xlu2 %v1211_v58, %s2207_s12 }
 0x20b   : > { %v925_v50 = vpop.permute.xlu1 %924  ;;  %v923_v53 = vpop.permute.xlu0 %922 }
 0x20c   : > { %v929_v1 = vadd.f32 %v925_v50, %v901_v43  ;;  %v928_v51 = vadd.f32 %v923_v53, %v900_v48  ;;  %v979_v52 = vpop.permute.xlu2 %978  ;;  %v1348_v43 = vmul.f32 %v1347_v39, %v2809_v11  ;;  %v1335_v48 = vmul.f32 %v1333_v45, %v2819_v61 }
 0x20d   : > { %v1334_v50 = vmul.f32 %v1333_v45, %v2821_v63  ;;  %v1075_v53 = vstv %s2845_s14  ;;  %v1485_v45 = vstv %s2891_s7  ;;  %s1932_s14 = sld [smem:[#allocation5 + $0x2e]] }
 0x20e   : > { %v957_v59 = vadd.f32 %v953_v3, %v929_v1  ;;  %v1076_v13 = vmul.f32 %v1075_v53, %v2726_v0  ;;  %s290_s7 = sld [smem:[#allocation4]] }
 0x211   : > { %1268 = vrot.lane.b32.xlu1 %v1264_v55, %s2202_s13  ;;  %1244 = vrot.lane.b32.xlu0 %v1239_v27, %s2206_s10  ;;  %v1361_v55 = vstv %s1919_s0  ;;  %s1933_s0 = sld [smem:[#allocation5 + $0x5f]] }
 0x212   : > { %1242 = vrot.lane.b32.xlu2 %v1238_v56, %s2206_s10 }
 0x213   : > { %v951_v18 = vpop.permute.xlu1 %950  ;;  %v939_v23 = vpop.permute.xlu0 %938 }
 0x214   : > { %v956_v57 = vadd.f32 %v951_v18, %v928_v51  ;;  %v943_v17 = vadd.f32 %v939_v23, %v2779_v24  ;;  %v995_v10 = vpop.permute.xlu2 %994  ;;  %v1363_v18 = vmul.f32 %v1361_v55, %v2819_v61  ;;  %v1362_v23 = vmul.f32 %v1361_v55, %v2821_v63 }
 0x216   : > { %v984_v41 = vadd.f32 %v979_v52, %v956_v57  ;;  %v1077_v52 = vmul.f32 %v1075_v53, %v2742_v47  ;;  %v1349_v57 = vmul.f32 %v1347_v39, %v2825_v2 }
 0x219   : > { %1284 = vrot.lane.b32.xlu1 %v1279_v4, %s2202_s13  ;;  %1282 = vrot.lane.b32.xlu0 %v1278_v60, %s2202_s13  ;;  %v2869_v4 = vld [vmem:[#allocation2 + $0x6] sm:$0xff]  ;;  %v1443_v60 = vstv %s2859_s9  ;;  %s2937_s9 = sld [smem:[#allocation5 + $0x23]] }
 0x21a   : > { %1270 = vrot.lane.b32.xlu2 %v1265_v32, %s2202_s13  ;;  %v1375_v32 = vstv %s1920_s30  ;;  %s1934_s30 = sld [smem:[#allocation5 + $0x2f]] }
 0x21b   : > { %v967_v5 = vpop.permute.xlu1 %966  ;;  %v965_v22 = vpop.permute.xlu0 %964 }
 0x21c   : > { %v971_v24 = vadd.f32 %v967_v5, %v943_v17  ;;  %v970_v20 = vadd.f32 %v965_v22, %v942_v37  ;;  %v1021_v6 = vpop.permute.xlu2 %1020  ;;  %v1444_v22 = vmul.f32 %v1443_v60, %v2869_v4 }
 0x21e   : > { %v999_v25 = vadd.f32 %v995_v10, %v971_v24  ;;  %v1377_v24 = vmul.f32 %v1375_v32, %v2825_v2 }
 0x221   : > { %1310 = vrot.lane.b32.xlu1 %v1306_v15, %s2204_s11  ;;  %1298 = vrot.lane.b32.xlu0 %v1293_v9, %s2204_s11 }
 0x222   : > { %1296 = vrot.lane.b32.xlu2 %v1292_v12, %s2204_s11 }
 0x223   : > { %v993_v14 = vpop.permute.xlu1 %992  ;;  %v981_v19 = vpop.permute.xlu0 %980 }
 0x224   : > { %v998_v49 = vadd.f32 %v993_v14, %v970_v20  ;;  %v985_v28 = vadd.f32 %v981_v19, %v957_v59  ;;  %v1037_v46 = vpop.permute.xlu2 %1036  ;;  %v2887_v14 = vld [vmem:[#allocation3 + $0xe] sm:$0xff]  ;;  %v1457_v19 = vstv %s1927_s27  ;;  %s2951_s27 = sld [smem:[#allocation5 + $0x60]] }
 0x225   : > { %v1459_v0 = vmul.f32 %v1457_v19, %v2887_v14  ;;  %v1487_v55 = vmul.f32 %v1485_v45, %v2887_v14 }
 0x226   : > { %v1026_v29 = vadd.f32 %v1021_v6, %v998_v49  ;;  %v1376_v6 = vmul.f32 %v1375_v32, %v2809_v11  ;;  %v2889_v49 = vld [vmem:[#allocation3 + $0x6] sm:$0xff] }
 0x227   : > { %v1458_v7 = vmul.f32 %v1457_v19, %v2889_v49 }
 0x229   : > { %1326 = vrot.lane.b32.xlu1 %v1321_v30, %s2203_s5  ;;  %1324 = vrot.lane.b32.xlu0 %v1320_v34, %s2203_s5 }
 0x22a   : > { %1312 = vrot.lane.b32.xlu2 %v1307_v35, %s2204_s11 }
 0x22b   : > { %v1009_v42 = vpop.permute.xlu1 %1008  ;;  %v1007_v3 = vpop.permute.xlu0 %1006 }
 0x22c   : > { %v1013_v36 = vadd.f32 %v1009_v42, %v985_v28  ;;  %v1012_v37 = vadd.f32 %v1007_v3, %v984_v41  ;;  %v1063_v38 = vpop.permute.xlu2 %1062 }
 0x22e   : > { %v1041_v58 = vadd.f32 %v1037_v46, %v1013_v36 }
 0x231   : > { %1352 = vrot.lane.b32.xlu1 %v1348_v43, %s2205_s23  ;;  %1340 = vrot.lane.b32.xlu0 %v1335_v48, %s2203_s5  ;;  %v1486_v48 = vmul.f32 %v1485_v45, %v2889_v49 }
 0x232   : > { %1338 = vrot.lane.b32.xlu2 %v1334_v50, %s2203_s5 }
 0x233   : > { %v1035_v1 = vpop.permute.xlu1 %1034  ;;  %v1023_v51 = vpop.permute.xlu0 %1022 }
 0x234   : > { %v1040_v40 = vadd.f32 %v1035_v1, %v1012_v37  ;;  %v1027_v54 = vadd.f32 %v1023_v51, %v999_v25  ;;  %v1091_v59 = vpop.permute.xlu2 %1090 }
 0x235   : > { %v2861_v27 = vadd.f32 %v1091_v59, %v1077_v52  ;;  %v1499_v52 = vstv %s1930_s26  ;;  %s3006_s26 = scalar_lea.vmem [#allocation12], %s2368_s8 }
 0x236   : > { %v1068_v56 = vadd.f32 %v1063_v38, %v1040_v40  ;;  %v1500_v59 = vmul.f32 %v1499_v52, %v2869_v4 }
 0x239   : > { %1368 = vrot.lane.b32.xlu1 %v1363_v18, %s2205_s23  ;;  %1366 = vrot.lane.b32.xlu0 %v1362_v23, %s2205_s23 }
 0x23a   : > { %1354 = vrot.lane.b32.xlu2 %v1349_v57, %s2205_s23 }
 0x23b   : > { %v1051_v47 = vpop.permute.xlu1 %1050  ;;  %v1049_v17 = vpop.permute.xlu0 %1048 }
 0x23c   : > { %v1055_v10 = vadd.f32 %v1051_v47, %v1027_v54  ;;  %v1054_v31 = vadd.f32 %v1049_v17, %v1026_v29  ;;  %v1117_v41 = vpop.permute.xlu2 %1116  ;;  %v1079_v29 = vstv %s2874_s21  ;;  %v1513_v17 = vstv %s1931_s15  ;;  %s1911_s21 = sld [smem:[#allocation5 + $0x54]] }
 0x23d   : > { %v1081_v42 = vmul.f32 %v1079_v29, %v2736_v16  ;;  %v1080_v3 = vmul.f32 %v1079_v29, %v2738_v44 }
 0x23e   : > { %v1616_v5 = vadd.f32 %v1068_v56, %v1054_v31 }
 0x240   : > { %v1626_v20 = vadd.f32 %v1616_v5, %v2788_v26 }
 0x241   : > { %1448 = vrot.lane.b32.xlu1 %v1444_v22, %s2202_s13  ;;  %1382 = vrot.lane.b32.xlu0 %v1377_v24, %s2207_s12 }
 0x242   : > { %v2881_v8 = vadd.f32 %v1626_v20, %v2721_v62  ;;  %1380 = vrot.lane.b32.xlu2 %v1376_v6, %s2207_s12  ;;  %v2893_v62 = vld [vmem:[#allocation2 + $0xe] sm:$0xff]  ;;  %v1527_v6 = vstv %s1932_s14  ;;  %s1715_s14 = sshll.u32 %s3006_s26, 4  ;;  %s1716_s14 = int_to_ptr.vmem [resolvable:$true] %s1715_s14 }
 0x243   : > { %v1089_v25 = vpop.permute.xlu1 %1088  ;;  %v1065_v15 = vpop.permute.xlu0 %1064  ;;  %v1445_v34 = vmul.f32 %v1443_v60, %v2893_v62  ;;  %v1501_v54 = vmul.f32 %v1499_v52, %v2893_v62  ;;  %v1514_v60 = vmul.f32 %v1513_v17, %v2889_v49 }
 0x244   : > { %v1094_v9 = vadd.f32 %v1089_v25, %v1076_v13  ;;  %v1069_v26 = vadd.f32 %v1065_v15, %v1041_v58  ;;  %v1133_v12 = vpop.permute.xlu2 %1132  ;;  %v1471_v58 = vstv %s2885_s6  ;;  %v1529_v25 = vmul.f32 %v1527_v6, %v2893_v62  ;;  %s1937_s6 = sld [smem:[#allocation5 + $0x61]] }
 0x245   : > { %v1472_v50 = vmul.f32 %v1471_v58, %v2869_v4  ;;  %v1528_v15 = vmul.f32 %v1527_v6, %v2869_v4 }
 0x246   : > { %v1617_v28 = vadd.f32 %v1069_v26, %v1055_v10  ;;  %v1122_v46 = vadd.f32 %v1117_v41, %v1094_v9  ;;  %v1515_v41 = vmul.f32 %v1513_v17, %v2887_v14 }
 0x248   : > { %v1627_v30 = vadd.f32 %v1617_v28, %v2799_v33 }
 0x249   : > { %1464 = vrot.lane.b32.xlu1 %v1459_v0, %s2202_s13  ;;  %1462 = vrot.lane.b32.xlu0 %v1458_v7, %s2202_s13  ;;  %v1541_v7 = vstv %s1933_s0 }
 0x24a   : > { %v2903_v35 = vadd.f32 %v1627_v30, %v2715_v21  ;;  %1450 = vrot.lane.b32.xlu2 %v1445_v34, %s2202_s13  ;;  %v1473_v21 = vmul.f32 %v1471_v58, %v2893_v62  ;;  %s2917_s13 = sld [smem:[#allocation5 + $0x59]]  ;;  %v1543_v34 = vmul.f32 %v1541_v7, %v2887_v14 }
 0x24b   : > { %v1105_v36 = vpop.permute.xlu1 %1104  ;;  %v1103_v37 = vpop.permute.xlu0 %1102 }
 0x24c   : > { %v1109_v38 = vadd.f32 %v1105_v36, %v1081_v42  ;;  %v1108_v39 = vadd.f32 %v1103_v37, %v1080_v3  ;;  %v1159_v33 = vpop.permute.xlu2 %1158  ;;  %v1542_v42 = vmul.f32 %v1541_v7, %v2889_v49  ;;  %v1255_v3 = vstv %s2937_s9 }
 0x24e   : > { %v1137_v43 = vadd.f32 %v1133_v12, %v1109_v38  ;;  %v1257_v38 = vmul.f32 %v1255_v3, %v2825_v2 }
 0x250   : > { %v1389_v47 = vstv %s2917_s13  ;;  %s1947_s13 = sshll.u32 %s2259_s1, 6 }
 0x251   : > { %1490 = vrot.lane.b32.xlu1 %v1486_v48, %s2204_s11  ;;  %1478 = vrot.lane.b32.xlu0 %v1473_v21, %s2204_s11  ;;  %v1390_v31 = vmul.f32 %v1389_v47, %v2821_v63  ;;  %v1391_v9 = vmul.f32 %v1389_v47, %v2819_v61  ;;  %s1714_s1 = scalar_lea.hbm %s3070_s4, %s1947_s13 }
 0x252   : > { %1476 = vrot.lane.b32.xlu2 %v1472_v50, %s2204_s11 }
 0x253   : > { %v1131_v16 = vpop.permute.xlu1 %1130  ;;  %v1119_v44 = vpop.permute.xlu0 %1118 }
 0x254   : > { %v1136_v53 = vadd.f32 %v1131_v16, %v1108_v39  ;;  %v1123_v1 = vadd.f32 %v1119_v44, %v2861_v27  ;;  %v1175_v51 = vpop.permute.xlu2 %1174 }
 0x256   : > { %v1164_v40 = vadd.f32 %v1159_v33, %v1136_v53 }
 0x259   : > { %1506 = vrot.lane.b32.xlu1 %v1501_v54, %s2203_s5  ;;  %1504 = vrot.lane.b32.xlu0 %v1500_v59, %s2203_s5  ;;  %v1555_v54 = vstv %s1934_s30  ;;  %s2141_s30 = scalar_lea.hbm %s3070_s4, 128 }
 0x25a   : > { %1492 = vrot.lane.b32.xlu2 %v1487_v55, %s2204_s11  ;;  %s2932_s11 = sld [smem:[#allocation5 + $0x29]] }
 0x25b   : > { %v1147_v27 = vpop.permute.xlu1 %1146  ;;  %v1145_v56 = vpop.permute.xlu0 %1144 }
 0x25c   : > { %v1151_v18 = vadd.f32 %v1147_v27, %v1123_v1  ;;  %v1150_v23 = vadd.f32 %v1145_v56, %v1122_v46  ;;  %v1201_v57 = vpop.permute.xlu2 %1200  ;;  %v1556_v27 = vmul.f32 %v1555_v54, %v2869_v4  ;;  %v1256_v56 = vmul.f32 %v1255_v3, %v2809_v11 }
 0x25e   : > { %v1179_v10 = vadd.f32 %v1175_v51, %v1151_v18 }
 0x260   : > { %v1403_v0 = vstv %s2932_s11  ;;  %s1717_s11 = sshll.u32 %s1714_s1, 4  ;;  %s1718_s11 = int_to_ptr.hbm [resolvable:$true] %s1717_s11 }
 0x261   : > { %1394 = vrot.lane.b32.xlu1 %v1390_v31, %s2207_s12  ;;  %1520 = vrot.lane.b32.xlu0 %v1515_v41, %s2203_s5  ;;  %v1404_v30 = vmul.f32 %v1403_v0, %v2809_v11  ;;  %v1405_v16 = vmul.f32 %v1403_v0, %v2825_v2  ;;  %v1557_v2 = vmul.f32 %v1555_v54, %v2893_v62  ;;  %s2135_s0 = sshra.s32 %s1718_s11, 4  ;;  %s2136_s0 = int_to_ptr.hbm [resolvable:$true] %s2135_s0 }
 0x262   : > { %1518 = vrot.lane.b32.xlu2 %v1514_v60, %s2203_s5  ;;  %s1923_s5 = sld [smem:[#allocation5 + $0x5a]]  ;;  %s2137_s9 = scalar_lea.hbm %s2136_s0, 64 }
 0x263   : > { %v1173_v32 = vpop.permute.xlu1 %1172  ;;  %v1161_v5 = vpop.permute.xlu0 %1160  ;;  %p2138_p4 = scmp.ne.s32.totalorder %s2136_s0, %s2137_s9  ;;  %p2142_p3 = scmp.lt.s32.totalorder %s2136_s0, %s3070_s4 }
 0x264   : > { %v1178_v22 = vadd.f32 %v1173_v32, %v1150_v23  ;;  %v1165_v24 = vadd.f32 %v1161_v5, %v1137_v43  ;;  %v1217_v20 = vpop.permute.xlu2 %1216  ;;  %v1259_v5 = vstv %s1911_s21  ;;  %p2143_p8 = scmp.lt.s32.totalorder %s2141_s30, %s2137_s9 }
 0x265   : > { %v1261_v11 = vmul.f32 %v1259_v5, %v2819_v61  ;;  %p2139_p6 = pnand %p2138_p4, %p2290_p11 }
 0x266   : > { %v1206_v13 = vadd.f32 %v1201_v57, %v1178_v22  ;;  %p2144_p0 = por %p2143_p8, %p2142_p3 }
 0x267   : > { %p2140_p13 = pneg %p2139_p6 }
 0x268   : > { %v1417_v58 = vstv %s1923_s5 }
 0x269   : > { %1534 = vrot.lane.b32.xlu1 %v1529_v25, %s2205_s23  ;;  %1532 = vrot.lane.b32.xlu0 %v1528_v15, %s2205_s23  ;;  %v1419_v21 = vmul.f32 %v1417_v58, %v2819_v61  ;;  %v1418_v50 = vmul.f32 %v1417_v58, %v2821_v63  ;;  %p2145_p5 = pnand %p2144_p0, %p2140_p13 }
 0x26a   : > { %1396 = vrot.lane.b32.xlu2 %v1391_v9, %s2207_s12  ;;  %v1597_v9 = vstv %s1937_s6 }
 0x26b   : > { %v1189_v26 = vpop.permute.xlu1 %1188  ;;  %v1187_v12 = vpop.permute.xlu0 %1186 }
 0x26c   : > { %v1193_v19 = vadd.f32 %v1189_v26, %v1165_v24  ;;  %v1192_v28 = vadd.f32 %v1187_v12, %v1164_v40  ;;  %v1243_v46 = vpop.permute.xlu2 %1242  ;;  %v1569_v40 = vstv %s2951_s27  ;;  %v1260_v24 = vmul.f32 %v1259_v5, %v2821_v63 }
 0x26d   : > { %v1570_v55 = vmul.f32 %v1569_v40, %v2889_v49  ;;  %v1571_v22 = vmul.f32 %v1569_v40, %v2887_v14  ;;  %v1599_v12 = vmul.f32 %v1597_v9, %v2887_v14 }
 0x26e   : > { %v1221_v29 = vadd.f32 %v1217_v20, %v1193_v19  ;;  %v1598_v19 = vmul.f32 %v1597_v9, %v2889_v49 }
 0x271   : > { %1408 = vrot.lane.b32.xlu1 %v1404_v30, %s2206_s10  ;;  %1548 = vrot.lane.b32.xlu0 %v1543_v34, %s2205_s23 }
 0x272   : > { %1546 = vrot.lane.b32.xlu2 %v1542_v42, %s2205_s23  ;;  %s1936_s23 = sld [smem:[#allocation5 + $0x30]] }
 0x273   : > { %v1215_v36 = vpop.permute.xlu1 %1214  ;;  %v1203_v37 = vpop.permute.xlu0 %1202 }
 0x274   : > { %v1220_v39 = vadd.f32 %v1215_v36, %v1192_v28  ;;  %v1207_v33 = vadd.f32 %v1203_v37, %v1179_v10  ;;  %v1271_v45 = vpop.permute.xlu2 %1270 }
 0x275   : > { %v1275_v43 = vadd.f32 %v1271_v45, %v1257_v38 }
 0x276   : > { %v1248_v48 = vadd.f32 %v1243_v46, %v1220_v39 }
 0x278   : > { %v1583_v10 = vstv %s1936_s23 }
 0x279   : > { %1424 = vrot.lane.b32.xlu1 %v1419_v21, %s2206_s10  ;;  %1422 = vrot.lane.b32.xlu0 %v1418_v50, %s2206_s10  ;;  %v1585_v60 = vmul.f32 %v1583_v10, %v2893_v62  ;;  %v1584_v32 = vmul.f32 %v1583_v10, %v2869_v4 }
 0x27a   : > { %1410 = vrot.lane.b32.xlu2 %v1405_v16, %s2206_s10 }
 0x27b   : > { %v1231_v44 = vpop.permute.xlu1 %1230  ;;  %v1229_v53 = vpop.permute.xlu0 %1228 }
 0x27c   : > { %v1235_v1 = vadd.f32 %v1231_v44, %v1207_v33  ;;  %v1234_v51 = vadd.f32 %v1229_v53, %v1206_v13  ;;  %v1297_v52 = vpop.permute.xlu2 %1296 }
 0x27e   : > { %v2960_v59 = vadd.f32 %v1248_v48, %v1234_v51 }
 0x281   : > { %1574 = vrot.lane.b32.xlu1 %v1570_v55, %s2207_s12  ;;  %1562 = vrot.lane.b32.xlu0 %v1557_v2, %s2207_s12 }
 0x282   : > { %1560 = vrot.lane.b32.xlu2 %v1556_v27, %s2207_s12 }
 0x283   : > { %v1269_v18 = vpop.permute.xlu1 %1268  ;;  %v1245_v23 = vpop.permute.xlu0 %1244 }
 0x284   : > { %v1274_v57 = vadd.f32 %v1269_v18, %v1256_v56  ;;  %v1249_v47 = vadd.f32 %v1245_v23, %v1221_v29  ;;  %v1313_v17 = vpop.permute.xlu2 %1312 }
 0x286   : > { %v2969_v31 = vadd.f32 %v1249_v47, %v1235_v1  ;;  %v1302_v41 = vadd.f32 %v1297_v52, %v1274_v57 }
 0x289   : > { %1590 = vrot.lane.b32.xlu1 %v1585_v60, %s2206_s10  ;;  %1588 = vrot.lane.b32.xlu0 %v1584_v32, %s2206_s10 }
 0x28a   : > { %1576 = vrot.lane.b32.xlu2 %v1571_v22, %s2207_s12  ;;  %s2983_s12 = sld [smem:[#allocation5 + $0x2a]] }
 0x28b   : > { %v1285_v20 = vpop.permute.xlu1 %1284  ;;  %v1283_v6 = vpop.permute.xlu0 %1282 }
 0x28c   : > { %v1289_v13 = vadd.f32 %v1285_v20, %v1261_v11  ;;  %v1288_v25 = vadd.f32 %v1283_v6, %v1260_v24  ;;  %v1339_v15 = vpop.permute.xlu2 %1338 }
 0x28e   : > { %v1317_v26 = vadd.f32 %v1313_v17, %v1289_v13 }
 0x290   : > { %v1435_v37 = vstv %s2983_s12 }
 0x291   : > { %1604 = vrot.lane.b32.xlu0 %v1599_v12, %s2206_s10  ;;  %v1437_v33 = vmul.f32 %v1435_v37, %v2893_v62  ;;  %v1436_v13 = vmul.f32 %v1435_v37, %v2869_v4 }
 0x292   : > { %1602 = vrot.lane.b32.xlu2 %v1598_v19, %s2206_s10  ;;  %s1925_s10 = sld [smem:[#allocation5 + $0x5b]] }
 0x293   : > { %v1311_v28 = vpop.permute.xlu1 %1310  ;;  %v1299_v46 = vpop.permute.xlu0 %1298 }
 0x294   : > { %v1316_v61 = vadd.f32 %v1311_v28, %v1288_v25  ;;  %v1303_v0 = vadd.f32 %v1299_v46, %v1275_v43  ;;  %v1355_v63 = vpop.permute.xlu2 %1354 }
 0x296   : > { %v1344_v7 = vadd.f32 %v1339_v15, %v1316_v61 }
 0x298   : > { %v1439_v24 = vstv %s1925_s10 }
 0x299   : > { %v1440_v25 = vmul.f32 %v1439_v24, %v2889_v49  ;;  %v1441_v49 = vmul.f32 %v1439_v24, %v2887_v14 }
 0x29b   : > { %v1327_v29 = vpop.permute.xlu1 %1326  ;;  %v1325_v30 = vpop.permute.xlu0 %1324 }
 0x29c   : > { %v1331_v34 = vadd.f32 %v1327_v29, %v1303_v0  ;;  %v1330_v42 = vadd.f32 %v1325_v30, %v1302_v41  ;;  %v1381_v3 = vpop.permute.xlu2 %1380 }
 0x29e   : > { %v1359_v36 = vadd.f32 %v1355_v63, %v1331_v34 }
 0x2a3   : > { %v1353_v38 = vpop.permute.xlu1 %1352  ;;  %v1341_v39 = vpop.permute.xlu0 %1340 }
 0x2a4   : > { %v1358_v45 = vadd.f32 %v1353_v38, %v1330_v42  ;;  %v1345_v58 = vadd.f32 %v1341_v39, %v1317_v26  ;;  %v1451_v48 = vpop.permute.xlu2 %1450 }
 0x2a5   : > { %v2987_v43 = vadd.f32 %v1451_v48, %v1437_v33 }
 0x2a6   : > { %v1386_v21 = vadd.f32 %v1381_v3, %v1358_v45 }
 0x2ab   : > { %v1369_v50 = vpop.permute.xlu1 %1368  ;;  %v1367_v16 = vpop.permute.xlu0 %1366 }
 0x2ac   : > { %v1373_v44 = vadd.f32 %v1369_v50, %v1345_v58  ;;  %v1372_v53 = vadd.f32 %v1367_v16, %v1344_v7  ;;  %v1477_v1 = vpop.permute.xlu2 %1476 }
 0x2b3   : > { %v1449_v51 = vpop.permute.xlu1 %1448  ;;  %v1383_v52 = vpop.permute.xlu0 %1382 }
 0x2b4   : > { %v1387_v40 = vadd.f32 %v1383_v52, %v1359_v36  ;;  %v1493_v54 = vpop.permute.xlu2 %1492  ;;  %v1454_v46 = vadd.f32 %v1449_v51, %v1436_v13 }
 0x2b6   : > { %v1482_v42 = vadd.f32 %v1477_v1, %v1454_v46  ;;  %v2031_v46 = vld [vmem:[%s2372_s24 + $0x10] sm:$0xff] }
 0x2bb   : > { %v1465_v55 = vpop.permute.xlu1 %1464  ;;  %v1463_v2 = vpop.permute.xlu0 %1462 }
 0x2bc   : > { %v1519_v27 = vpop.permute.xlu2 %1518  ;;  %v1468_v61 = vadd.f32 %v1463_v2, %v1440_v25  ;;  %v1469_v38 = vadd.f32 %v1465_v55, %v1441_v49  ;;  %v1636_v55 = vstv %s290_s7 }
 0x2be   : > { %v1497_v58 = vadd.f32 %v1493_v54, %v1469_v38  ;;  %v2037_v38 = vld [vmem:[%s2380_s16 + $0x30] sm:$0xff] }
 0x2c3   : > { %v1491_v56 = vpop.permute.xlu1 %1490  ;;  %v1479_v62 = vpop.permute.xlu0 %1478 }
 0x2c4   : > { %v1397_v18 = vpop.permute.xlu2 %1396  ;;  %v1496_v7 = vadd.f32 %v1491_v56, %v1468_v61 }
 0x2c5   : > { %v1401_v20 = vadd.f32 %v1397_v18, %v1373_v44 }
 0x2c6   : > { %v1524_v36 = vadd.f32 %v1519_v27, %v1496_v7  ;;  %v2033_v7 = vld [vmem:[%s2372_s24 + $0x30] sm:$0xff] }
 0x2cb   : > { %v1507_v23 = vpop.permute.xlu1 %1506  ;;  %v1505_v57 = vpop.permute.xlu0 %1504 }
 0x2cc   : > { %v1547_v47 = vpop.permute.xlu2 %1546  ;;  %v1510_v3 = vadd.f32 %v1505_v57, %v1482_v42 }
 0x2cd   : > { %v1552_v39 = vadd.f32 %v1547_v47, %v1524_v36 }
 0x2d3   : > { %v1395_v17 = vpop.permute.xlu1 %1394  ;;  %v1521_v10 = vpop.permute.xlu0 %1520 }
 0x2d4   : > { %v1411_v32 = vpop.permute.xlu2 %1410  ;;  %v1400_v6 = vadd.f32 %v1395_v17, %v1372_v53 }
 0x2d5   : > { %v1415_v26 = vadd.f32 %v1411_v32, %v1387_v40 }
 0x2db   : > { %v1535_v41 = vpop.permute.xlu1 %1534  ;;  %v1533_v60 = vpop.permute.xlu0 %1532 }
 0x2dc   : > { %v1561_v11 = vpop.permute.xlu2 %1560  ;;  %v1538_v33 = vadd.f32 %v1533_v60, %v1510_v3  ;;  %v2036_v3 = vld [vmem:[%s2380_s16 + $0x20] sm:$0xff] }
 0x2de   : > { %v1566_v48 = vadd.f32 %v1561_v11, %v1538_v33 }
 0x2e3   : > { %v1409_v5 = vpop.permute.xlu1 %1408  ;;  %v1549_v22 = vpop.permute.xlu0 %1548 }
 0x2e4   : > { %v1414_v12 = vadd.f32 %v1409_v5, %v1386_v21  ;;  %v1577_v34 = vpop.permute.xlu2 %1576 }
 0x2eb   : > { %v1425_v15 = vpop.permute.xlu1 %1424  ;;  %v1423_v9 = vpop.permute.xlu0 %1422 }
 0x2ec   : > { %v1429_v19 = vadd.f32 %v1425_v15, %v1401_v20  ;;  %v1428_v28 = vadd.f32 %v1423_v9, %v1400_v6  ;;  %v1603_v21 = vpop.permute.xlu2 %1602 }
 0x2ee   : > { %v1621_v0 = vadd.f32 %v1429_v19, %v1415_v26  ;;  %v1620_v63 = vadd.f32 %v1428_v28, %v1414_v12  ;;  %v2030_v19 = vld [vmem:[%s2372_s24] sm:$0xff] }
 0x2f0   : > { %v1629_v29 = vadd.f32 %v1621_v0, %v2969_v31  ;;  %v1628_v30 = vadd.f32 %v1620_v63, %v2960_v59  ;;  %v1483_v31 = vadd.f32 %v1479_v62, %v2987_v43  ;;  %v1525_v59 = vadd.f32 %v1521_v10, %v1497_v58  ;;  %v2032_v0 = vld [vmem:[%s2372_s24 + $0x20] sm:$0xff] }
 0x2f2   : > { %v1511_v53 = vadd.f32 %v1507_v23, %v1483_v31  ;;  %v1553_v1 = vadd.f32 %v1549_v22, %v1525_v59  ;;  %v2038_v31 = vld [vmem:[%s2372_s24 + $0x8] sm:$0xff] }
 0x2f3   : > { %v1563_v4 = vpop.permute.xlu0 %1562  ;;  %v1575_v37 = vpop.permute.xlu1 %1574 }
 0x2f4   : > { %v1580_v45 = vadd.f32 %v1575_v37, %v1552_v39  ;;  %v1539_v51 = vadd.f32 %v1535_v41, %v1511_v53  ;;  %v1581_v2 = vadd.f32 %v1577_v34, %v1553_v1  ;;  %v2034_v34 = vld [vmem:[%s2380_s16] sm:$0xff]  ;;  %v2040_v53 = vld [vmem:[%s2372_s24 + $0x28] sm:$0xff] }
 0x2f6   : > { %v1608_v16 = vadd.f32 %v1603_v21, %v1580_v45  ;;  %v1567_v27 = vadd.f32 %v1563_v4, %v1539_v51  ;;  %v2035_v4 = vld [vmem:[%s2380_s16 + $0x10] sm:$0xff] }
 0x2fb   : > { %v1589_v50 = vpop.permute.xlu0 %1588  ;;  %v1591_v40 = vpop.permute.xlu1 %1590 }
 0x2fc   : > { %v1594_v44 = vadd.f32 %v1589_v50, %v1566_v48  ;;  %v1595_v18 = vadd.f32 %v1591_v40, %v1567_v27  ;;  %v2044_v27 = vld [vmem:[%s2380_s16 + $0x28] sm:$0xff] }
 0x2fe   : > { %v1622_v14 = vadd.f32 %v1608_v16, %v1594_v44  ;;  %v2039_v16 = vld [vmem:[%s2372_s24 + $0x18] sm:$0xff] }
 0x300   : > { %v1632_v52 = vadd.f32 %v1628_v30, %v1622_v14  ;;  %v2041_v14 = vld [vmem:[%s2372_s24 + $0x38] sm:$0xff]  ;;  %s1703_s24 = scalar_lea.sflag [#allocation7], %s2365_s25 }
 0x302   : > { %v1634_v56 = vadd.f32 %v1632_v52, %v2881_v8  ;;  %v2042_v52 = vld [vmem:[%s2380_s16 + $0x8] sm:$0xff] }
 0x303   : > { %v1605_v54 = vpop.permute.xlu0 %1604 }
 0x304   : > { %v1637_v57 = vadd.f32 %v1636_v55, %v1634_v56  ;;  %v1609_v47 = vadd.f32 %v1605_v54, %v1581_v2  ;;  %v2045_v54 = vld [vmem:[%s2380_s16 + $0x38] sm:$0xff] }
 0x306   : > { %v1938_v17 = vmul.f32 -1.442695, %v1637_v57  ;;  %v1623_v43 = vadd.f32 %v1609_v47, %v1595_v18 }
 0x308   : > { %2022 = vpow2.f32 %v1938_v17  ;;  %v1633_v62 = vadd.f32 %v1629_v29, %v1623_v43 }
 0x30a   : > { %v1635_v23 = vadd.f32 %v1633_v62, %v2903_v35 }
 0x30c   : > { %v1638_v10 = vadd.f32 %v1636_v55, %v1635_v23  ;;  %v2043_v55 = vld [vmem:[%s2380_s16 + $0x18] sm:$0xff] }
 0x30e   : > { %v2023_v60 = vpop.eup %2022  ;;  %v1939_v41 = vmul.f32 -1.442695, %v1638_v10 }
 0x30f   : > { %v1645_v32 = vadd.f32 1.0, %v2023_v60 }
 0x310   : > { %2024 = vpow2.f32 %v1939_v41 }
 0x311   : > { %2026 = vrcp.f32 %v1645_v32  ;;  %v1658_v20 = vand.u32 2147483648, %v1645_v32  ;;  %v1656_v13 = vand.u32 2147483647, %v1645_v32  ;;  %vm1652_vm5 = vweird.f32 %v1645_v32 }
 0x313   : > { %v1659_v15 = vor.u32 1.1754944e-38, %v1658_v20  ;;  %vm1657_vm7 = vcmp.eq.f32.partialorder %v1656_v13, 8.507059e+37 }
 0x316   : > { %v2025_v5 = vpop.eup %2024 }
 0x317   : > { %v2027_v22 = vpop.eup %2026  ;;  %v1646_v11 = vadd.f32 1.0, %v2025_v5 }
 0x318   : > { %v1648_v8 = vmul.f32 %v2027_v22, %v1645_v32  ;;  %vm1653_vm4 = vweird.f32 %v2027_v22 }
 0x319   : > { %2028 = vrcp.f32 %v1646_v11  ;;  %vm1654_vm6 = vmor %vm1652_vm5, %vm1653_vm4  ;;  %v1673_v37 = vand.u32 2147483648, %v1646_v11  ;;  %v1671_v45 = vand.u32 2147483647, %v1646_v11  ;;  %vm1667_vm10 = vweird.f32 %v1646_v11 }
 0x31a   : > { %v1649_v24 = vsub.f32 1.0, %v1648_v8 }
 0x31b   : > { %v1674_v48 = vor.u32 1.1754944e-38, %v1673_v37  ;;  %vm1672_vm12 = vcmp.eq.f32.partialorder %v1671_v45, 8.507059e+37 }
 0x31c   : > { %v1650_v6 = vmul.f32 %v2027_v22, %v1649_v24 }
 0x31e   : > { %v1651_v35 = vadd.f32 %v2027_v22, %v1650_v6 }
 0x31f   : > { %v2029_v25 = vpop.eup %2028 }
 0x320   : > { %v1655_v9 = vsel %vm1654_vm6, %v2027_v22, %v1651_v35  ;;  %v1663_v26 = vmul.f32 %v2029_v25, %v1646_v11  ;;  %vm1668_vm9 = vweird.f32 %v2029_v25 }
 0x321   : > { %v1660_v12 = vsel %vm1657_vm7, %v1659_v15, %v1655_v9  ;;  %vm1669_vm11 = vmor %vm1667_vm10, %vm1668_vm9 }
 0x322   : > { %v1677_v28 = vmul.f32 %v2030_v19, %v1660_v12  ;;  %v1679_v61 = vmul.f32 %v2031_v46, %v1660_v12  ;;  %v1681_v63 = vmul.f32 %v2032_v0, %v1660_v12  ;;  %v1683_v29 = vmul.f32 %v2033_v7, %v1660_v12 }
 0x323   : > { %v1664_v30 = vsub.f32 1.0, %v1663_v26 }
 0x324   : > { %v1685_v42 = vadd.f32 %v2034_v34, %v1677_v28  ;;  %v1687_v49 = vadd.f32 %v2035_v4, %v1679_v61  ;;  %v1689_v36 = vadd.f32 %v2036_v3, %v1681_v63  ;;  %v1691_v39 = vadd.f32 %v2037_v38, %v1683_v29 }
 0x325   : > { %v1665_v33 = vmul.f32 %v2029_v25, %v1664_v30 }
 0x326   : > { %1694 = vst.msk [vmem:[%s3006_s26] sm:$0xff] %vm1693_vm8, %v1685_v42 }
 0x327   : > { %1696 = vst.msk [vmem:[%s3006_s26 + $0x10] sm:$0xff] %vm1693_vm8, %v1687_v49  ;;  %v1666_v58 = vadd.f32 %v2029_v25, %v1665_v33 }
 0x328   : > { %1698 = vst.msk [vmem:[%s3006_s26 + $0x20] sm:$0xff] %vm1693_vm8, %v1689_v36 }
 0x329   : > { %1700 = vst.msk [vmem:[%s3006_s26 + $0x30] sm:$0xff] %vm1693_vm8, %v1691_v39  ;;  %v1670_v21 = vsel %vm1669_vm11, %v2029_v25, %v1666_v58 }
 0x32a   : > { %v1675_v50 = vsel %vm1672_vm12, %v1674_v48, %v1670_v21 }
 0x32b   : > { %v1678_v59 = vmul.f32 %v2038_v31, %v1675_v50  ;;  %v1680_v44 = vmul.f32 %v2039_v16, %v1675_v50  ;;  %v1682_v1 = vmul.f32 %v2040_v53, %v1675_v50  ;;  %v1684_v51 = vmul.f32 %v2041_v14, %v1675_v50 }
 0x32d   : > { %v1686_v40 = vadd.f32 %v2042_v52, %v1678_v59  ;;  %v1688_v2 = vadd.f32 %v2043_v55, %v1680_v44  ;;  %v1690_v56 = vadd.f32 %v2044_v27, %v1682_v1  ;;  %v1692_v18 = vadd.f32 %v2045_v54, %v1684_v51 }
 0x32f   : > { %1695 = vst.msk [vmem:[%s3006_s26 + $0x8] sm:$0xff] %vm1693_vm8, %v1686_v40 }
 0x330   : > { %1697 = vst.msk [vmem:[%s3006_s26 + $0x18] sm:$0xff] %vm1693_vm8, %v1688_v2 }
 0x331   : > { %1699 = vst.msk [vmem:[%s3006_s26 + $0x28] sm:$0xff] %vm1693_vm8, %v1690_v56 }
 0x332   : > { %1701 = vst.msk [vmem:[%s3006_s26 + $0x38] sm:$0xff] %vm1693_vm8, %v1692_v18 }
 0x333   : > { %2148 = shalt.err (!%p2145_p5)
}
 0x334   : > { %s2208_s25 = smov 128   ;;  %s2209_s21 = smov 8  }
 0x335   : > { %1956 = dma.vmem_to_hbm [thread:$0]  (%p2290_p11), %s1716_s14, 1024, %s1718_s11, %s1703_s24, %s2208_s25, %s2208_s25, %s2209_s21  }
 0x336 PF: > { %s1732_s6 = sand.u32 1, %s2183_s17   ;;  %p3082_p9 = scmp.ge.s32.totalorder %s2195_s20, 2 }
 0x337   : > { %s1733_s12 = scalar_lea.sflag [#allocation7], %s1732_s6 }
 0x338   : > { %p1970_p10 = pnand %p3082_p9, %p2294_p12 }
 0x33a   : > { %p1971_p1 = pneg %p1970_p10 }
 0x33c   : > { %2178 = dma.done.wait (%p1971_p1), %s1733_s12, 1024  }
 0x33d   : > { %2180 = vsyncadd (%p1971_p1), %s1733_s12, 4294966272  ;;  %s3083_s10 = sld [smem:[#allocation17_spill]]  ;;  %p22_p2 = scmp.ge.s32.totalorder %s2263_s22, 4  }
 0x33e   : > { %s3084_s17 = smov %s2187_s18  ;;  %s3085_s18 = smov %s2191_s19 }
 0x33f   : > { %s3087_s20 = smov %s2263_s22  ;;  %24 = sbr.rel (!%p22_p2) target bundleno = 11 (0xb), region = 99 }
 0x343   : > { %s3086_s19 = smov %s3083_s10 }
 0x344   :  { %1739 = vsyncpa [#allocation6], 1 }
 0x345   :  { %1741 = vsyncpa [#allocation6 + $0x1], 1 }
 0x346   :  { %1742 = vsyncpa [#allocation11], 1 }
 0x347   :  { %1744 = vsyncpa [#allocation11 + $0x1], 1 }
 0x348   :  { %1745 = vsyncpa [#allocation7], 1 }
 0x349   :  { %1747 = vsyncpa [#allocation7 + $0x1], 1 }
 0x34a   :  { %1748 = vsyncpa [#allocation8], 1 }
 0x34b   :  { %1750 = vsyncpa [#allocation8 + $0x1], 1 }

</bundles_post_ra>
